<compile_context>
chip_gen: v7x
topology: tpu7x:2x2x1
jax: 0.10.0
libtpu: 0.0.40
codegen_flags: <defaults>
</compile_context>

<pallas_src>
import jax
import jax.numpy as jnp
from jax import lax
from jax.experimental import pallas as pl
from jax.experimental.pallas import tpu as pltpu

DIM = 32          # in/out channels of EModel's Downsample
KSIZE = 4
STRIDE = 2
PAD = 1


# --------------------------------------------------------------------------
# Kernels
# --------------------------------------------------------------------------
def _conv_kernel_fused(y_ref, w_ref, b_ref, o_ref):
    """Fused kernel: one (M,128)@(128,128) matmul + shifted-add tap combine.

    y_ref: (bt, hp2, wp2p, 4*Cin)   bf16 space-to-depth input tile
    w_ref: (4*Cin, 4*Cout)          bf16, 4 tap matrices concatenated along N
    b_ref: (1, Cout)                f32 bias
    o_ref: (bt, h_out, w_out*Cout)  lane-dense output tile (last dim 256 here)
    """
    bt, hp2, wp2p, cin4 = y_ref.shape
    _, h_out, wc = o_ref.shape
    c_out = w_ref.shape[1] // 4
    w_out = wc // c_out

    # Single MXU matmul: M = bt*hp2*wp2p (multiple of 8), K = 4C, N = 4*Cout.
    # bf16 operands, f32 accumulation (no Precision.HIGHEST multi-pass).
    y = y_ref[...].reshape(bt * hp2 * wp2p, cin4)
    z = jnp.dot(y, w_ref[...], preferred_element_type=jnp.float32)
    z = z.reshape(bt, hp2, wp2p, 4 * c_out)

    # Tap t=(a,b): out[io, jo, :] += z[io+a, jo+b, t*Cout:(t+1)*Cout]
    out = (z[:, 0:h_out,     0:w_out,             0:    c_out] +
           z[:, 0:h_out,     1:w_out + 1,     c_out:2 * c_out] +
           z[:, 1:h_out + 1, 0:w_out,     2 * c_out:3 * c_out] +
           z[:, 1:h_out + 1, 1:w_out + 1, 3 * c_out:4 * c_out])
    out = out + b_ref[...]                              # (1, Cout) broadcast

    # Lane-dense store: merge (w_out, c_out) into the lane axis (unmasked vst).
    o_ref[...] = out.reshape(bt, h_out, wc).astype(o_ref.dtype)


def _conv_kernel_taps(y_ref, w_ref, b_ref, o_ref):
    """Fallback kernel (previously validated structure): 4 matmuls at N=Cout,
    NHWC 4D block store.  Only used if the fused kernel fails to lower."""
    bt, hp2, wp2p, cin4 = y_ref.shape
    _, h_out, w_out, c_out = o_ref.shape
    rows = bt * h_out * w_out

    y = y_ref[...]
    acc = None
    for t, (a, b) in enumerate(((0, 0), (0, 1), (1, 0), (1, 1))):
        slab = y[:, a:a + h_out, b:b + w_out, :]
        mat = slab.reshape(rows, cin4)
        part = jnp.dot(mat, w_ref[t], preferred_element_type=jnp.float32)
        acc = part if acc is None else acc + part
    acc = acc + b_ref[...]
    o_ref[...] = acc.reshape(bt, h_out, w_out, c_out).astype(o_ref.dtype)


# --------------------------------------------------------------------------
# Tiling helpers
# --------------------------------------------------------------------------
def _vmem_capacity_bytes():
    try:
        info = pltpu.get_tpu_info()
        cap = getattr(info, "vmem_capacity_bytes", None)
        if cap:
            return int(cap)
    except Exception:
        pass
    return 64 * 1024 * 1024          # conservative fallback (v7x physical VMEM)


def _pick_batch_tile(batch, per_item_bytes, budget_bytes):
    """Largest divisor of `batch` whose per-step working set fits the budget.

    Small problems collapse to a single grid step (on v5e/v6e the grid is a
    serial loop, so extra steps are pure ~0.35us/step overhead); large batches
    split so double-buffered tiles stay inside VMEM (64 MiB physical on v7x,
    where multiple steps also let both TensorCores shard the "parallel" axis).
    """
    best = 1
    for cand in range(1, batch + 1):
        if batch % cand == 0 and cand * per_item_bytes <= budget_bytes:
            best = cand
    return best


# --------------------------------------------------------------------------
# Forward pass
# --------------------------------------------------------------------------
def emodel_forward(x, weight, bias, *, batch_tile=None):
    """EModel forward: Conv2d(C, C, k=4, s=2, p=1) on NCHW `x`.

    x:      (B, C, H, W) float32, H and W even
    weight: (C_out, C_in, 4, 4)  (PyTorch OIHW layout)
    bias:   (C_out,)
    returns (B, C_out, H//2, W//2)
    """
    B, C, H, W = x.shape
    c_out = weight.shape[0]
    assert weight.shape == (c_out, C, KSIZE, KSIZE)
    assert H % 2 == 0 and W % 2 == 0, "stride-2 k=4 p=1 conv: H, W must be even"
    h_out, w_out = H // 2, W // 2
    hp2 = (H + 2 * PAD) // 2                 # s2d height (= h_out + 1)
    wp2 = (W + 2 * PAD) // 2                 # s2d width  (= w_out + 1)
    wp2p = ((wp2 + 7) // 8) * 8              # pad width to a sublane multiple

    # ---------------- wrapper layout plumbing: one pad + one transpose ------
    xp = jnp.pad(x, ((0, 0), (0, 0),
                     (PAD, PAD),
                     (PAD, PAD + 2 * (wp2p - wp2))))
    # s2d(2): y[b, i, j, (2*di+dj)*C + ci] = xp[b, ci, 2i+di, 2j+dj]
    y = xp.reshape(B, C, hp2, 2, wp2p, 2)
    y = jnp.transpose(y, (0, 2, 4, 3, 5, 1)).reshape(B, hp2, wp2p, 4 * C)
    y = y.astype(jnp.bfloat16)               # halve input HBM traffic

    # Tap weights: block t=(a,b): W[(2*di+dj)*C+ci, t*Cout+co] = w[co,ci,2a+di,2b+dj]
    wt = jnp.transpose(weight, (2, 3, 1, 0))             # (kh, kw, ci, co)
    tap_blocks = [wt[2 * a:2 * a + 2, 2 * b:2 * b + 2].reshape(4 * C, c_out)
                  for a in (0, 1) for b in (0, 1)]
    w_all = jnp.concatenate(tap_blocks, axis=1).astype(jnp.bfloat16)  # (4C, 4*Cout)
    w_taps = jnp.stack(tap_blocks, axis=0).astype(jnp.bfloat16)       # (4, 4C, Cout)
    b2 = bias.astype(jnp.float32).reshape(1, c_out)

    # ---------------- VMEM-aware batch tiling -------------------------------
    in_item = hp2 * wp2p * 4 * C * 2          # bf16 input tile per batch element
    z_item = hp2 * wp2p * 4 * c_out * 4       # f32 matmul result per batch element
    out_item = h_out * w_out * c_out * 4      # f32 output tile per batch element
    per_item = 2 * in_item + 2 * out_item + 3 * z_item  # dbl-buffered io + temps
    cap = _vmem_capacity_bytes()
    if batch_tile is None:
        batch_tile = _pick_batch_tile(B, per_item, int(0.35 * cap))
    if B % batch_tile != 0:
        raise ValueError(f"batch_tile={batch_tile} must divide batch={B}")
    bt = batch_tile
    # TODO(synk): add spatial (H) tiling for very large images where even a
    # single-image tile exceeds the VMEM budget.
    vmem_limit = int(min(0.8 * cap, max(32 << 20, 2 * bt * per_item + (1 << 20))))

    grid = (B // bt,)
    cparams = pltpu.CompilerParams(dimension_semantics=("parallel",),
                                   vmem_limit_bytes=vmem_limit)

    # NOTE: called eagerly (not under jit) so the lowering safety net below can
    # catch a Mosaic failure of the fused kernel and fall back.
    try:
        out_flat = pl.pallas_call(
            _conv_kernel_fused,
            out_shape=jax.ShapeDtypeStruct((B, h_out, w_out * c_out), x.dtype),
            grid_spec=pltpu.PrefetchScalarGridSpec(
                num_scalar_prefetch=0,
                grid=grid,
                in_specs=[
                    pl.BlockSpec((bt, hp2, wp2p, 4 * C), lambda i: (i, 0, 0, 0)),
                    pl.BlockSpec((4 * C, 4 * c_out), lambda i: (0, 0)),
                    pl.BlockSpec((1, c_out), lambda i: (0, 0)),
                ],
                out_specs=pl.BlockSpec((bt, h_out, w_out * c_out),
                                       lambda i: (i, 0, 0))),
            compiler_params=cparams,
        )(y, w_all, b2)
        out_nhwc = out_flat.reshape(B, h_out, w_out, c_out)
    except Exception:
        # Lowering safety net: same math, per-tap matmuls + NHWC block store.
        out_nhwc = pl.pallas_call(
            _conv_kernel_taps,
            out_shape=jax.ShapeDtypeStruct((B, h_out, w_out, c_out), x.dtype),
            grid_spec=pltpu.PrefetchScalarGridSpec(
                num_scalar_prefetch=0,
                grid=grid,
                in_specs=[
                    pl.BlockSpec((bt, hp2, wp2p, 4 * C), lambda i: (i, 0, 0, 0)),
                    pl.BlockSpec((4, 4 * C, c_out), lambda i: (0, 0, 0)),
                    pl.BlockSpec((1, c_out), lambda i: (0, 0)),
                ],
                out_specs=pl.BlockSpec((bt, h_out, w_out, c_out),
                                       lambda i: (i, 0, 0, 0))),
            compiler_params=cparams,
        )(y, w_taps, b2)

    # NHWC -> NCHW to match the PyTorch module's output layout.
    # TODO(synk): skip this transpose (one full HBM pass) if the consumer
    # accepts NHWC.
    return jnp.transpose(out_nhwc, (0, 3, 1, 2))


def reference(x, weight, bias):
    """Pure-JAX f32 reference of Conv2d(k=4, s=2, p=1) for verification."""
    out = lax.conv_general_dilated(
        x, weight,
        window_strides=(STRIDE, STRIDE),
        padding=((PAD, PAD), (PAD, PAD)),
        dimension_numbers=("NCHW", "OIHW", "NCHW"),
        precision=lax.Precision.HIGHEST)
    return out + bias.reshape(1, -1, 1, 1)


if __name__ == "__main__":
    B, C, H, W = 2, DIM, 16, 16
    key = jax.random.PRNGKey(0)
    kx, kw, kb = jax.random.split(key, 3)
    x = jax.random.normal(kx, (B, C, H, W), jnp.float32)
    weight = 0.05 * jax.random.normal(kw, (C, C, KSIZE, KSIZE), jnp.float32)
    bias = 0.05 * jax.random.normal(kb, (C,), jnp.float32)

    out = jax.block_until_ready(emodel_forward(x, weight, bias))
    ref = jax.block_until_ready(reference(x, weight, bias))

    assert out.shape == (B, C, H // 2, W // 2), out.shape
    max_err = float(jnp.max(jnp.abs(out - ref)))
    # bf16 MXU operands with f32 accumulation over an effective K=512
    # contraction vs. an f32 HIGHEST reference -> tolerance 2e-2.
    assert jnp.allclose(out, ref, atol=2e-2, rtol=2e-2), max_err
    print("KERNEL_OK")
</pallas_src>

<mosaic_0001>
module attributes {stable_mosaic.version = 11 : i64} {
  func.func @_conv_kernel_fused(%arg0: i32, %arg1: memref<2x9x16x128xbf16, #tpu.memory_space<vmem>>, %arg2: memref<128x128xbf16, #tpu.memory_space<vmem>>, %arg3: memref<1x32xf32, #tpu.memory_space<vmem>>, %arg4: memref<2x8x256xf32, #tpu.memory_space<vmem>>) attributes {dimension_semantics = [#tpu.dimension_semantics<parallel>], iteration_bounds = array<i64: 1>, scalar_prefetch = 0 : i64, scratch_operands = 0 : i64, tpu.core_type = #tpu.core_type<tc>, window_params = [{transform_indices = @transform_0, window_bounds = array<i64: 2, 9, 16, 128>}, {pipeline_mode = #tpu.pipeline_mode<synchronous>, transform_indices = @transform_1, window_bounds = array<i64: 128, 128>}, {pipeline_mode = #tpu.pipeline_mode<synchronous>, transform_indices = @transform_2, window_bounds = array<i64: 1, 32>}, {transform_indices = @transform_3, window_bounds = array<i64: 2, 8, 256>}]} {
    %c0 = arith.constant 0 : index
    %c0_0 = arith.constant 0 : index
    %c0_1 = arith.constant 0 : index
    %c0_2 = arith.constant 0 : index
    %0 = vector.load %arg1[%c0, %c0_0, %c0_1, %c0_2] : memref<2x9x16x128xbf16, #tpu.memory_space<vmem>>, vector<2x9x16x128xbf16>
    %1 = vector.shape_cast %0 : vector<2x9x16x128xbf16> to vector<288x128xbf16>
    %c0_3 = arith.constant 0 : index
    %c0_4 = arith.constant 0 : index
    %2 = vector.load %arg2[%c0_3, %c0_4] : memref<128x128xbf16, #tpu.memory_space<vmem>>, vector<128x128xbf16>
    %cst = arith.constant dense<0.000000e+00> : vector<288x128xf32>
    %3 = tpu.matmul %1, %2, %cst {dimension_numbers = #tpu.dot_dimension_numbers<[1], [0], [0], [1], [0, 0, 1, 1], [], []>} : vector<288x128xbf16>, vector<128x128xbf16>, vector<288x128xf32> -> vector<288x128xf32>
    %4 = vector.shape_cast %3 : vector<288x128xf32> to vector<2x9x16x128xf32>
    %5 = vector.extract_strided_slice %4 {offsets = [0, 0, 0, 0], sizes = [2, 8, 8, 32], strides = [1, 1, 1, 1]} : vector<2x9x16x128xf32> to vector<2x8x8x32xf32>
    %6 = vector.extract_strided_slice %4 {offsets = [0, 0, 1, 32], sizes = [2, 8, 8, 32], strides = [1, 1, 1, 1]} : vector<2x9x16x128xf32> to vector<2x8x8x32xf32>
    %7 = arith.addf %5, %6 : vector<2x8x8x32xf32>
    %8 = vector.extract_strided_slice %4 {offsets = [0, 1, 0, 64], sizes = [2, 8, 8, 32], strides = [1, 1, 1, 1]} : vector<2x9x16x128xf32> to vector<2x8x8x32xf32>
    %9 = arith.addf %7, %8 : vector<2x8x8x32xf32>
    %10 = vector.extract_strided_slice %4 {offsets = [0, 1, 1, 96], sizes = [2, 8, 8, 32], strides = [1, 1, 1, 1]} : vector<2x9x16x128xf32> to vector<2x8x8x32xf32>
    %11 = arith.addf %9, %10 : vector<2x8x8x32xf32>
    %c0_5 = arith.constant 0 : index
    %c0_6 = arith.constant 0 : index
    %12 = vector.load %arg3[%c0_5, %c0_6] : memref<1x32xf32, #tpu.memory_space<vmem>>, vector<1x32xf32>
    %13 = vector.shape_cast %12 : vector<1x32xf32> to vector<1x1x1x32xf32>
    %14 = vector.broadcast %13 : vector<1x1x1x32xf32> to vector<2x8x8x32xf32>
    %15 = arith.addf %11, %14 : vector<2x8x8x32xf32>
    %16 = vector.shape_cast %15 : vector<2x8x8x32xf32> to vector<2x8x256xf32>
    %c0_7 = arith.constant 0 : index
    %c0_8 = arith.constant 0 : index
    %c0_9 = arith.constant 0 : index
    %17 = vector.load %arg4[%c0_7, %c0_8, %c0_9] : memref<2x8x256xf32, #tpu.memory_space<vmem>>, vector<2x8x256xf32>
    tpu.vector_store %arg4[%c0_7, %c0_8, %c0_9], %16 {strides = array<i32>} : memref<2x8x256xf32, #tpu.memory_space<vmem>>, vector<2x8x256xf32>,
    return
  }
  func.func @transform_0(%arg0: i32) -> (i32, i32, i32, i32) {
    %c0_i32 = arith.constant 0 : i32
    %c0_i32_0 = arith.constant 0 : i32
    %c0_i32_1 = arith.constant 0 : i32
    %c0_i32_2 = arith.constant 0 : i32
    return %arg0, %c0_i32, %c0_i32_0, %c0_i32_1 : i32, i32, i32, i32
  }
  func.func @transform_1(%arg0: i32) -> (i32, i32) {
    %c0_i32 = arith.constant 0 : i32
    %c0_i32_0 = arith.constant 0 : i32
    %c0_i32_1 = arith.constant 0 : i32
    return %c0_i32, %c0_i32_0 : i32, i32
  }
  func.func @transform_2(%arg0: i32) -> (i32, i32) {
    %c0_i32 = arith.constant 0 : i32
    %c0_i32_0 = arith.constant 0 : i32
    %c0_i32_1 = arith.constant 0 : i32
    return %c0_i32, %c0_i32_0 : i32, i32
  }
  func.func @transform_3(%arg0: i32) -> (i32, i32, i32) {
    %c0_i32 = arith.constant 0 : i32
    %c0_i32_0 = arith.constant 0 : i32
    %c0_i32_1 = arith.constant 0 : i32
    return %arg0, %c0_i32, %c0_i32_0 : i32, i32, i32
  }
}

module attributes {stable_mosaic.version = 11 : i64} {
  func.func @_conv_kernel_taps(%arg0: i32, %arg1: memref<2x9x16x128xbf16, #tpu.memory_space<vmem>>, %arg2: memref<4x128x32xbf16, #tpu.memory_space<vmem>>, %arg3: memref<1x32xf32, #tpu.memory_space<vmem>>, %arg4: memref<2x8x8x32xf32, #tpu.memory_space<vmem>>) attributes {dimension_semantics = [#tpu.dimension_semantics<parallel>], iteration_bounds = array<i64: 1>, scalar_prefetch = 0 : i64, scratch_operands = 0 : i64, tpu.core_type = #tpu.core_type<tc>, window_params = [{transform_indices = @transform_0, window_bounds = array<i64: 2, 9, 16, 128>}, {pipeline_mode = #tpu.pipeline_mode<synchronous>, transform_indices = @transform_1, window_bounds = array<i64: 4, 128, 32>}, {pipeline_mode = #tpu.pipeline_mode<synchronous>, transform_indices = @transform_2, window_bounds = array<i64: 1, 32>}, {transform_indices = @transform_3, window_bounds = array<i64: 2, 8, 8, 32>}]} {
    %c0 = arith.constant 0 : index
    %c0_0 = arith.constant 0 : index
    %c0_1 = arith.constant 0 : index
    %c0_2 = arith.constant 0 : index
    %0 = vector.load %arg1[%c0, %c0_0, %c0_1, %c0_2] : memref<2x9x16x128xbf16, #tpu.memory_space<vmem>>, vector<2x9x16x128xbf16>
    %1 = vector.extract_strided_slice %0 {offsets = [0, 0, 0, 0], sizes = [2, 8, 8, 128], strides = [1, 1, 1, 1]} : vector<2x9x16x128xbf16> to vector<2x8x8x128xbf16>
    %2 = vector.shape_cast %1 : vector<2x8x8x128xbf16> to vector<128x128xbf16>
    %c0_3 = arith.constant 0 : index
    %c0_4 = arith.constant 0 : index
    %c0_5 = arith.constant 0 : index
    %3 = vector.load %arg2[%c0_3, %c0_4, %c0_5] : memref<4x128x32xbf16, #tpu.memory_space<vmem>>, vector<1x128x32xbf16>
    %4 = vector.shape_cast %3 : vector<1x128x32xbf16> to vector<128x32xbf16>
    %cst = arith.constant dense<0.000000e+00> : vector<128x32xf32>
    %5 = tpu.matmul %2, %4, %cst {dimension_numbers = #tpu.dot_dimension_numbers<[1], [0], [0], [1], [0, 0, 1, 1], [], []>} : vector<128x128xbf16>, vector<128x32xbf16>, vector<128x32xf32> -> vector<128x32xf32>
    %6 = vector.extract_strided_slice %0 {offsets = [0, 0, 1, 0], sizes = [2, 8, 8, 128], strides = [1, 1, 1, 1]} : vector<2x9x16x128xbf16> to vector<2x8x8x128xbf16>
    %7 = vector.shape_cast %6 : vector<2x8x8x128xbf16> to vector<128x128xbf16>
    %c1 = arith.constant 1 : index
    %c0_6 = arith.constant 0 : index
    %c0_7 = arith.constant 0 : index
    %8 = vector.load %arg2[%c1, %c0_6, %c0_7] : memref<4x128x32xbf16, #tpu.memory_space<vmem>>, vector<1x128x32xbf16>
    %9 = vector.shape_cast %8 : vector<1x128x32xbf16> to vector<128x32xbf16>
    %cst_8 = arith.constant dense<0.000000e+00> : vector<128x32xf32>
    %10 = tpu.matmul %7, %9, %cst_8 {dimension_numbers = #tpu.dot_dimension_numbers<[1], [0], [0], [1], [0, 0, 1, 1], [], []>} : vector<128x128xbf16>, vector<128x32xbf16>, vector<128x32xf32> -> vector<128x32xf32>
    %11 = arith.addf %5, %10 : vector<128x32xf32>
    %12 = vector.extract_strided_slice %0 {offsets = [0, 1, 0, 0], sizes = [2, 8, 8, 128], strides = [1, 1, 1, 1]} : vector<2x9x16x128xbf16> to vector<2x8x8x128xbf16>
    %13 = vector.shape_cast %12 : vector<2x8x8x128xbf16> to vector<128x128xbf16>
    %c2 = arith.constant 2 : index
    %c0_9 = arith.constant 0 : index
    %c0_10 = arith.constant 0 : index
    %14 = vector.load %arg2[%c2, %c0_9, %c0_10] : memref<4x128x32xbf16, #tpu.memory_space<vmem>>, vector<1x128x32xbf16>
    %15 = vector.shape_cast %14 : vector<1x128x32xbf16> to vector<128x32xbf16>
    %cst_11 = arith.constant dense<0.000000e+00> : vector<128x32xf32>
    %16 = tpu.matmul %13, %15, %cst_11 {dimension_numbers = #tpu.dot_dimension_numbers<[1], [0], [0], [1], [0, 0, 1, 1], [], []>} : vector<128x128xbf16>, vector<128x32xbf16>, vector<128x32xf32> -> vector<128x32xf32>
    %17 = arith.addf %11, %16 : vector<128x32xf32>
    %18 = vector.extract_strided_slice %0 {offsets = [0, 1, 1, 0], sizes = [2, 8, 8, 128], strides = [1, 1, 1, 1]} : vector<2x9x16x128xbf16> to vector<2x8x8x128xbf16>
    %19 = vector.shape_cast %18 : vector<2x8x8x128xbf16> to vector<128x128xbf16>
    %c3 = arith.constant 3 : index
    %c0_12 = arith.constant 0 : index
    %c0_13 = arith.constant 0 : index
    %20 = vector.load %arg2[%c3, %c0_12, %c0_13] : memref<4x128x32xbf16, #tpu.memory_space<vmem>>, vector<1x128x32xbf16>
    %21 = vector.shape_cast %20 : vector<1x128x32xbf16> to vector<128x32xbf16>
    %cst_14 = arith.constant dense<0.000000e+00> : vector<128x32xf32>
    %22 = tpu.matmul %19, %21, %cst_14 {dimension_numbers = #tpu.dot_dimension_numbers<[1], [0], [0], [1], [0, 0, 1, 1], [], []>} : vector<128x128xbf16>, vector<128x32xbf16>, vector<128x32xf32> -> vector<128x32xf32>
    %23 = arith.addf %17, %22 : vector<128x32xf32>
    %c0_15 = arith.constant 0 : index
    %c0_16 = arith.constant 0 : index
    %24 = vector.load %arg3[%c0_15, %c0_16] : memref<1x32xf32, #tpu.memory_space<vmem>>, vector<1x32xf32>
    %25 = vector.broadcast %24 : vector<1x32xf32> to vector<128x32xf32>
    %26 = arith.addf %23, %25 : vector<128x32xf32>
    %27 = vector.shape_cast %26 : vector<128x32xf32> to vector<2x8x8x32xf32>
    %c0_17 = arith.constant 0 : index
    %c0_18 = arith.constant 0 : index
    %c0_19 = arith.constant 0 : index
    %c0_20 = arith.constant 0 : index
    %28 = vector.load %arg4[%c0_17, %c0_18, %c0_19, %c0_20] : memref<2x8x8x32xf32, #tpu.memory_space<vmem>>, vector<2x8x8x32xf32>
    tpu.vector_store %arg4[%c0_17, %c0_18, %c0_19, %c0_20], %27 {strides = array<i32>} : memref<2x8x8x32xf32, #tpu.memory_space<vmem>>, vector<2x8x8x32xf32>,
    return
  }
  func.func @transform_0(%arg0: i32) -> (i32, i32, i32, i32) {
    %c0_i32 = arith.constant 0 : i32
    %c0_i32_0 = arith.constant 0 : i32
    %c0_i32_1 = arith.constant 0 : i32
    %c0_i32_2 = arith.constant 0 : i32
    return %arg0, %c0_i32, %c0_i32_0, %c0_i32_1 : i32, i32, i32, i32
  }
  func.func @transform_1(%arg0: i32) -> (i32, i32, i32) {
    %c0_i32 = arith.constant 0 : i32
    %c0_i32_0 = arith.constant 0 : i32
    %c0_i32_1 = arith.constant 0 : i32
    %c0_i32_2 = arith.constant 0 : i32
    return %c0_i32, %c0_i32_0, %c0_i32_1 : i32, i32, i32
  }
  func.func @transform_2(%arg0: i32) -> (i32, i32) {
    %c0_i32 = arith.constant 0 : i32
    %c0_i32_0 = arith.constant 0 : i32
    %c0_i32_1 = arith.constant 0 : i32
    return %c0_i32, %c0_i32_0 : i32, i32
  }
  func.func @transform_3(%arg0: i32) -> (i32, i32, i32, i32) {
    %c0_i32 = arith.constant 0 : i32
    %c0_i32_0 = arith.constant 0 : i32
    %c0_i32_1 = arith.constant 0 : i32
    %c0_i32_2 = arith.constant 0 : i32
    return %arg0, %c0_i32, %c0_i32_0, %c0_i32_1 : i32, i32, i32, i32
  }
}

</mosaic_0001>

<bundles_post_ra>
// kernel: tpu_custom_call.1
= control target key start
LH: loop header
LB: loop body
LE: loop exit
PB: predicated region body
PF: predicated region fallthrough
CT: control target
= control target key end

     0   :  { %8 = vsyncpa [#allocation3], 0  ;;  %s1709_s0 = inlined_call_operand.hbm [shape: bf16[2,9,16,128], index: 0, kind: input, shape index: {}]   ;;  %s1710_s1 = inlined_call_operand.hbm [shape: bf16[128,128], index: 1, kind: input, shape index: {}]   ;;  %s1711_s2 = inlined_call_operand.vmem [shape: f32[1,32], index: 2, kind: input, shape index: {}]   ;;  %s1712_s3 = inlined_call_operand.hbm [shape: f32[2,8,256], index: 3, kind: output, shape index: {}]  }
   0x1   :  { %9 = vsyncpa [#allocation6], 0 }
   0x2   :  { %10 = vsyncpa [#allocation4], 0  ;;  %s1322_s12 = smov [#allocation2]   ;;  %s1250_s16 = scalar_lea.hbm %s1709_s0, 2304 }
   0x3   :  { %s16_s13 = sshll.u32 %s1322_s12, 4  ;;  %p1251_p0 = scmp.ne.s32.totalorder %s1709_s0, %s1250_s16  ;;  %s17_s13 = int_to_ptr.vmem [resolvable:$true] %s16_s13 }
   0x4   :  { %p1254_p1 = scmp.lt.u32.totalorder %s1250_s16, %s1709_s0 }
   0x6   :  { %p1256_p2 = pnand %p1254_p1, %p1251_p0 }
   0x8   :  { %1259 = shalt.err (!%p1256_p2)
}
   0x9   :  { %s1260_s21 = scalar_lea.vmem %s17_s13, 2304  ;;  %p1265_p4 = scmp.lt.s32.totalorder %s17_s13, %s17_s13 }
   0xa   :  { %p1261_p3 = scmp.ne.s32.totalorder %s17_s13, %s1260_s21  ;;  %p1266_p5 = scmp.lt.s32.totalorder %s1260_s21, %s1260_s21 }
   0xc   :  { %p1267_p6 = por %p1266_p5, %p1265_p4 }
   0xe   :  { %p1268_p7 = pnand %p1267_p6, %p1261_p3 }
  0x10   :  { %1271 = shalt.err (!%p1268_p7)
}
  0x11   :  { %s1323_s22 = smov 64   ;;  %s1324_s23 = smov 4  }
  0x12   :  { %22 = dma.hbm_to_vmem [thread:$0]  %s1709_s0, 2304, %s17_s13, [#allocation3], %s1323_s22, %s1323_s22, %s1324_s23  }
  0x13   :  { %s1325_s26 = smov [#allocation5]   ;;  %s1272_s30 = scalar_lea.hbm %s1710_s1, 1024 }
  0x14   :  { %s28_s27 = sshll.u32 %s1325_s26, 4  ;;  %p1273_p8 = scmp.ne.s32.totalorder %s1710_s1, %s1272_s30  ;;  %s29_s27 = int_to_ptr.vmem [resolvable:$true] %s28_s27 }
  0x15   :  { %p1276_p9 = scmp.lt.u32.totalorder %s1272_s30, %s1710_s1 }
  0x17   :  { %p1278_p10 = pnand %p1276_p9, %p1273_p8 }
  0x19   :  { %1281 = shalt.err (!%p1278_p10)
}
  0x1a   :  { %s1282_s8 = scalar_lea.vmem %s29_s27, 1024  ;;  %p1287_p12 = scmp.lt.s32.totalorder %s29_s27, %s29_s27 }
  0x1b   :  { %p1283_p11 = scmp.ne.s32.totalorder %s29_s27, %s1282_s8  ;;  %p1288_p13 = scmp.lt.s32.totalorder %s1282_s8, %s1282_s8 }
  0x1d   :  { %p1289_p0 = por %p1288_p13, %p1287_p12 }
  0x1f   :  { %p1290_p1 = pnand %p1289_p0, %p1283_p11 }
  0x21   :  { %1293 = shalt.err (!%p1290_p1)
}
  0x22   :  { %34 = dma.hbm_to_vmem [thread:$0]  %s1710_s1, 1024, %s29_s27, [#allocation6], %s1323_s22, %s1323_s22, %s1324_s23  }
  0x23   :  { %1316 = dma.done.wait [#allocation3], 2304  }
  0x24   :  { %1317 = vsyncadd [#allocation3], 4294964992 }
  0x25   :  { %1318 = dma.done.wait [#allocation6], 1024  }
  0x26   :  { %1319 = vsyncadd [#allocation6], 4294966272  ;;  %v1224_v0 = vld [vmem:[#allocation5] sm:$0xff]   ;;  %v1225_v1 = vld [vmem:[#allocation5 + $0x8] sm:$0xff]   ;;  %vm461_vm0 = vcmask 1046528   ;;  %s1326_s1 = smov 32  }
  0x27   :  { %1145 = vmatprep.subr.bf16.mxu0 %v1224_v0  ;;  %1197 = vmatprep.subr.bf16.mxu1 %v1224_v0  ;;  %v1226_v2 = vld [vmem:[#allocation5 + $0x10] sm:$0xff]   ;;  %v1227_v3 = vld [vmem:[#allocation5 + $0x18] sm:$0xff]   ;;  %v1233_v5 = vld [vmem:[#allocation2 + $0x50] sm:$0xff]   ;;  %s1327_s10 = smov 96   ;;  %vm1055_vm1 = vcmask 261120   ;;  %vm1058_vm2 = vcmask 523264  }
  0x28   :  { %1146 = vmatpush3.bf16.msra.mxu0 %v1224_v0  ;;  %1205 = vmatpush3.bf16.msra.mxu1 %v1224_v0  ;;  %v1232_v4 = vld [vmem:[#allocation2] sm:$0xff]   ;;  %v1228_v6 = vld [vmem:[#allocation5 + $0x20] sm:$0xff]   ;;  %v1229_v7 = vld [vmem:[#allocation5 + $0x28] sm:$0xff]   ;;  %vm1061_vm3 = vcmask 785408  }
  0x29   :  { %1147 = vmatprep.subr.bf16.mxu0 %v1225_v1  ;;  %1198 = vmatprep.subr.bf16.mxu1 %v1225_v1  ;;  %v1230_v8 = vld [vmem:[#allocation5 + $0x30] sm:$0xff]   ;;  %v1231_v9 = vld [vmem:[#allocation5 + $0x38] sm:$0xff]   ;;  %v1235_v11 = vld [vmem:[#allocation2 + $0x58] sm:$0xff]  }
  0x2a   :  { %1161 = vmatprep.mubr.bf16.mxu0 %v1232_v4  ;;  %1181 = vmatprep.mubr.bf16.mxu1 %v1233_v5  ;;  %v1234_v10 = vld [vmem:[#allocation2 + $0x8] sm:$0xff]   ;;  %v1236_v12 = vld [vmem:[#allocation2 + $0x60] sm:$0xff]   ;;  %v1238_v13 = vld [vmem:[#allocation2 + $0x10] sm:$0xff]  }
  0x2b   :  { %v1237_v14 = vld [vmem:[#allocation2 + $0x68] sm:$0xff]   ;;  %v1239_v15 = vld [vmem:[#allocation2 + $0x18] sm:$0xff]   ;;  %v1240_v16 = vld [vmem:[#allocation2 + $0x70] sm:$0xff]  }
  0x2c   :  { %1148 = vmatpush3.bf16.msra.mxu0 %v1225_v1  ;;  %1206 = vmatpush3.bf16.msra.mxu1 %v1225_v1  ;;  %v1242_v17 = vld [vmem:[#allocation2 + $0x20] sm:$0xff]   ;;  %v1241_v18 = vld [vmem:[#allocation2 + $0x78] sm:$0xff]   ;;  %v1243_v19 = vld [vmem:[#allocation2 + $0x28] sm:$0xff]  }
  0x2d   :  { %1149 = vmatprep.subr.bf16.mxu0 %v1226_v2  ;;  %1199 = vmatprep.subr.bf16.mxu1 %v1226_v2  ;;  %v1244_v20 = vld [vmem:[#allocation2 + $0x80] sm:$0xff]   ;;  %v1246_v21 = vld [vmem:[#allocation2 + $0x30] sm:$0xff]   ;;  %v1245_v22 = vld [vmem:[#allocation2 + $0x88] sm:$0xff]  }
  0x2e   :  { %v1247_v23 = vld [vmem:[#allocation2 + $0x38] sm:$0xff]   ;;  %v1248_v24 = vld [vmem:[#allocation2 + $0x40] sm:$0xff]   ;;  %v1249_v25 = vld [vmem:[#allocation2 + $0x48] sm:$0xff]  }
  0x30   :  { %1150 = vmatpush3.bf16.msra.mxu0 %v1226_v2  ;;  %1207 = vmatpush3.bf16.msra.mxu1 %v1226_v2 }
  0x31   :  { %1151 = vmatprep.subr.bf16.mxu0 %v1227_v3  ;;  %1200 = vmatprep.subr.bf16.mxu1 %v1227_v3 }
  0x34   :  { %1152 = vmatpush3.bf16.msra.mxu0 %v1227_v3  ;;  %1208 = vmatpush3.bf16.msra.mxu1 %v1227_v3 }
  0x35   :  { %1153 = vmatprep.subr.bf16.mxu0 %v1228_v6  ;;  %1201 = vmatprep.subr.bf16.mxu1 %v1228_v6 }
  0x38   :  { %1154 = vmatpush3.bf16.msra.mxu0 %v1228_v6  ;;  %1209 = vmatpush3.bf16.msra.mxu1 %v1228_v6 }
  0x39   :  { %1155 = vmatprep.subr.bf16.mxu0 %v1229_v7  ;;  %1202 = vmatprep.subr.bf16.mxu1 %v1229_v7 }
  0x3c   :  { %1156 = vmatpush3.bf16.msra.mxu0 %v1229_v7  ;;  %1210 = vmatpush3.bf16.msra.mxu1 %v1229_v7 }
  0x3d   :  { %1157 = vmatprep.subr.bf16.mxu0 %v1230_v8  ;;  %1203 = vmatprep.subr.bf16.mxu1 %v1230_v8 }
  0x40   :  { %1158 = vmatpush3.bf16.msra.mxu0 %v1230_v8  ;;  %1211 = vmatpush3.bf16.msra.mxu1 %v1230_v8 }
  0x41   :  { %1159 = vmatprep.subr.bf16.mxu0 %v1231_v9  ;;  %1204 = vmatprep.subr.bf16.mxu1 %v1231_v9 }
  0x44   :  { %1160 = vmatpush3.bf16.msra.mxu0 %v1231_v9  ;;  %1212 = vmatpush3.bf16.msra.mxu1 %v1231_v9 }
  0x47   :  { %1162 = vmatmul.mubr.bf16.vlgmr.msra.gmra.mrb[0].mxu0 %v1234_v10  ;;  %1182 = vmatmul.mubr.bf16.vlgmr.msra.gmra.mrb[0].mxu1 %v1235_v11 }
  0x48   :  { %1185 = vmatprep.mubr.bf16.mxu1 %v1236_v12  ;;  %1165 = vmatprep.mubr.bf16.mxu0 %v1238_v13 }
  0x4f   :  { %1186 = vmatmul.mubr.bf16.gmra.mrb[4].mxu1 %v1237_v14  ;;  %1166 = vmatmul.mubr.bf16.gmra.mrb[4].mxu0 %v1239_v15 }
  0x50   :  { %1189 = vmatprep.mubr.bf16.mxu1 %v1240_v16  ;;  %1169 = vmatprep.mubr.bf16.mxu0 %v1242_v17 }
  0x57   :  { %1190 = vmatmul.mubr.bf16.gmra.mrb[8].mxu1 %v1241_v18  ;;  %1170 = vmatmul.mubr.bf16.gmra.mrb[8].mxu0 %v1243_v19 }
  0x58   :  { %1193 = vmatprep.mubr.bf16.mxu1 %v1244_v20  ;;  %1173 = vmatprep.mubr.bf16.mxu0 %v1246_v21 }
  0x5f   :  { %1194 = vmatmul.mubr.bf16.gmra.mrb[12].mxu1 %v1245_v22  ;;  %1174 = vmatmul.mubr.bf16.gmra.mrb[12].mxu0 %v1247_v23 }
  0x60   :  { %1177 = vmatprep.mubr.bf16.mxu0 %v1248_v24 }
  0x67   :  { %1178 = vmatmul.mubr.bf16.gmra.mrb[16].mxu0 %v1249_v25 }
 0x11a   :  { %v1381_v26 = vpop.f32.mrb[0].mxu0  ;;  %v1383_v27 = vpop.f32.mrb[0].mxu1 }
 0x11b   :  { %v465_v28 = vrot.slane %v1381_v26, 1  ;;  %594 = vrot.lane.b32.xlu1 %v1383_v27, %s1323_s22  ;;  %v1388_v29 = vpop.f32.mrb[1].mxu1  ;;  %576 = vrot.lane.b32.xlu0 %v1381_v26, %s1323_s22  ;;  %v1392_v30 = vpop.f32.mrb[1].mxu0  ;;  %v492_v33 = vrot.slane %v1383_v27, 1 }
 0x11c   :  { %v1164_v31 = vpop.f32.mrb[2].mxu0  ;;  %v1184_v32 = vpop.f32.mrb[2].mxu1  ;;  %v489_v38 = vrot.slane %v1388_v29, 1  ;;  %v462_v39 = vrot.slane %v1392_v30, 1 }
 0x11d   :  { %v466_v34 = vrot.slane %v1164_v31, 1  ;;  %v493_v35 = vrot.slane %v1184_v32, 1  ;;  %v289_v36 = vpop.f32.mrb[3].mxu0  ;;  %v369_v37 = vpop.f32.mrb[3].mxu1 }
 0x11e   :  { %v463_v40 = vrot.slane %v289_v36, 1  ;;  %v490_v41 = vrot.slane %v369_v37, 1 }
 0x11f   :  { %592 = vrot.lane.b32.xlu0 %v1388_v29, %s1323_s22  ;;  %v494_v42 = vsel %vm461_vm0, %v492_v33, %v493_v35  ;;  %v467_v43 = vsel %vm461_vm0, %v465_v28, %v466_v34 }
 0x120   :  { %666 = vrot.lane.b32.xlu1 %v494_v42, %s1326_s1  ;;  %v491_v44 = vsel %vm461_vm0, %v489_v38, %v490_v41  ;;  %v464_v45 = vsel %vm461_vm0, %v462_v39, %v463_v40 }
 0x122   :  { %v1404_v46 = vpop.f32.mrb[4].mxu1  ;;  %v1406_v47 = vpop.f32.mrb[4].mxu0 }
 0x123   :  { %512 = vrot.lane.b32.xlu0 %v467_v43, %s1327_s10  ;;  %v498_v48 = vrot.slane %v1404_v46, 1  ;;  %v1410_v49 = vpop.f32.mrb[5].mxu1  ;;  %v471_v50 = vrot.slane %v1406_v47, 1  ;;  %v1413_v51 = vpop.f32.mrb[5].mxu0 }
 0x124   :  { %528 = vrot.lane.b32.xlu1 %v491_v44, %s1327_s10  ;;  %v495_v52 = vrot.slane %v1410_v49, 1  ;;  %v1188_v53 = vpop.f32.mrb[6].mxu1  ;;  %v468_v54 = vrot.slane %v1413_v51, 1  ;;  %v1168_v55 = vpop.f32.mrb[6].mxu0 }
 0x125   :  { %v499_v56 = vrot.slane %v1188_v53, 1  ;;  %v385_v57 = vpop.f32.mrb[7].mxu1  ;;  %v472_v58 = vrot.slane %v1168_v55, 1  ;;  %v305_v59 = vpop.f32.mrb[7].mxu0 }
 0x126   :  { %v496_v60 = vrot.slane %v385_v57, 1  ;;  %v469_v61 = vrot.slane %v305_v59, 1 }
 0x127   :  { %530 = vrot.lane.b32.xlu0 %v494_v42, %s1327_s10  ;;  %v1420_v62 = vsel %vm461_vm0, %v471_v50, %v472_v58  ;;  %v500_v63 = vsel %vm461_vm0, %v498_v48, %v499_v56 }
 0x128   :  { %598 = vrot.lane.b32.xlu1 %v1404_v46, %s1323_s22  ;;  %v1426_v0 = vsel %vm461_vm0, %v468_v54, %v469_v61  ;;  %v1429_v1 = vsel %vm461_vm0, %v495_v52, %v496_v60 }
 0x12a   :  { %v1431_v2 = vpop.f32.mrb[8].mxu1  ;;  %v1433_v3 = vpop.f32.mrb[8].mxu0 }
 0x12b   :  { %648 = vrot.lane.b32.xlu0 %v467_v43, %s1326_s1  ;;  %v504_v4 = vrot.slane %v1431_v2, 1  ;;  %v1437_v5 = vpop.f32.mrb[9].mxu1  ;;  %v477_v6 = vrot.slane %v1433_v3, 1  ;;  %v1440_v7 = vpop.f32.mrb[9].mxu0 }
 0x12c   :  { %578 = vrot.lane.b32.xlu1 %v1413_v51, %s1323_s22  ;;  %v501_v8 = vrot.slane %v1437_v5, 1  ;;  %v1192_v9 = vpop.f32.mrb[10].mxu1  ;;  %v474_v10 = vrot.slane %v1440_v7, 1  ;;  %v1172_v11 = vpop.f32.mrb[10].mxu0 }
 0x12d   :  { %v505_v12 = vrot.slane %v1192_v9, 1  ;;  %v401_v13 = vpop.f32.mrb[11].mxu1  ;;  %v478_v14 = vrot.slane %v1172_v11, 1  ;;  %v321_v15 = vpop.f32.mrb[11].mxu0 }
 0x12e   :  { %v502_v16 = vrot.slane %v401_v13, 1  ;;  %v475_v17 = vrot.slane %v321_v15, 1 }
 0x12f   :  { %510 = vrot.lane.b32.xlu0 %v464_v45, %s1327_s10  ;;  %v479_v18 = vsel %vm461_vm0, %v477_v6, %v478_v14  ;;  %v506_v19 = vsel %vm461_vm0, %v504_v4, %v505_v12 }
 0x130   :  { %516 = vrot.lane.b32.xlu1 %v1420_v62, %s1327_s10  ;;  %v503_v20 = vsel %vm461_vm0, %v501_v8, %v502_v16  ;;  %v476_v21 = vsel %vm461_vm0, %v474_v10, %v475_v17 }
 0x132   :  { %v1195_v22 = vpop.f32.mrb[12].mxu1  ;;  %v1453_v23 = vpop.f32.mrb[12].mxu0 }
 0x133   :  { %664 = vrot.lane.b32.xlu0 %v491_v44, %s1326_s1  ;;  %v645_v24 = vrot.slane %v1195_v22, 1  ;;  %v1456_v25 = vpop.f32.mrb[13].mxu1  ;;  %v483_v28 = vrot.slane %v1453_v23, 1  ;;  %v1459_v31 = vpop.f32.mrb[13].mxu0 }
 0x134   :  { %670 = vrot.lane.b32.xlu1 %v500_v63, %s1326_s1  ;;  %v507_v32 = vrot.slane %v1456_v25, 1  ;;  %v1196_v33 = vpop.f32.mrb[14].mxu1  ;;  %v480_v34 = vrot.slane %v1459_v31, 1  ;;  %v1176_v35 = vpop.f32.mrb[14].mxu0 }
 0x135   :  { %v646_v36 = vrot.slane %v1196_v33, 1  ;;  %v417_v37 = vpop.f32.mrb[15].mxu1  ;;  %v484_v38 = vrot.slane %v1176_v35, 1  ;;  %v337_v39 = vpop.f32.mrb[15].mxu0 }
 0x136   :  { %v508_v40 = vrot.slane %v417_v37, 1  ;;  %v481_v41 = vrot.slane %v337_v39, 1 }
 0x137   :  { %580 = vrot.lane.b32.xlu0 %v1406_v47, %s1323_s22  ;;  %v485_v42 = vsel %vm461_vm0, %v483_v28, %v484_v38  ;;  %v647_v43 = vsel %vm461_vm0, %v645_v24, %v646_v36 }
 0x138   :  { %514 = vrot.lane.b32.xlu1 %v1426_v0, %s1327_s10  ;;  %v509_v44 = vsel %vm461_vm0, %v507_v32, %v508_v40  ;;  %v482_v45 = vsel %vm461_vm0, %v480_v34, %v481_v41 }
 0x13a   :  { %v1472_v48 = vpop.f32.mrb[16].mxu0 }
 0x13b   :  { %596 = vrot.lane.b32.xlu0 %v1410_v49, %s1323_s22  ;;  %v486_v50 = vrot.slane %v1472_v48, 1  ;;  %v350_v52 = vpop.f32.mrb[17].mxu0 }
 0x13c   :  { %532 = vrot.lane.b32.xlu1 %v1429_v1, %s1327_s10  ;;  %v642_v53 = vrot.slane %v350_v52, 1  ;;  %v1180_v54 = vpop.f32.mrb[18].mxu0 }
 0x13d   :  { %v487_v55 = vrot.slane %v1180_v54, 1  ;;  %v353_v56 = vpop.f32.mrb[19].mxu0 }
 0x13e   :  { %v643_v57 = vrot.slane %v353_v56, 1 }
 0x13f   :  { %534 = vrot.lane.b32.xlu0 %v500_v63, %s1327_s10  ;;  %v488_v58 = vsel %vm461_vm0, %v486_v50, %v487_v55 }
 0x140   :  { %650 = vrot.lane.b32.xlu1 %v1426_v0, %s1326_s1  ;;  %v644_v59 = vsel %vm461_vm0, %v642_v53, %v643_v57 }
 0x143   :  { %652 = vrot.lane.b32.xlu0 %v1420_v62, %s1326_s1 }
 0x144   :  { %602 = vrot.lane.b32.xlu1 %v1431_v2, %s1323_s22 }
 0x147   :  { %668 = vrot.lane.b32.xlu0 %v1429_v1, %s1326_s1 }
 0x148   :  { %582 = vrot.lane.b32.xlu1 %v1440_v7, %s1323_s22 }
 0x14b   :  { %584 = vrot.lane.b32.xlu0 %v1433_v3, %s1323_s22 }
 0x14c   :  { %520 = vrot.lane.b32.xlu1 %v479_v18, %s1327_s10 }
 0x14f   :  { %600 = vrot.lane.b32.xlu0 %v1437_v5, %s1323_s22 }
 0x150   :  { %674 = vrot.lane.b32.xlu1 %v506_v19, %s1326_s1 }
 0x153   :  { %538 = vrot.lane.b32.xlu0 %v506_v19, %s1327_s10 }
 0x154   :  { %536 = vrot.lane.b32.xlu1 %v503_v20, %s1327_s10 }
 0x157   :  { %656 = vrot.lane.b32.xlu0 %v479_v18, %s1326_s1 }
 0x158   :  { %654 = vrot.lane.b32.xlu1 %v476_v21, %s1326_s1 }
 0x15b   :  { %518 = vrot.lane.b32.xlu0 %v476_v21, %s1327_s10 }
 0x15c   :  { %606 = vrot.lane.b32.xlu1 %v1195_v22, %s1323_s22 }
 0x15f   :  { %672 = vrot.lane.b32.xlu0 %v503_v20, %s1326_s1 }
 0x160   :  { %586 = vrot.lane.b32.xlu1 %v1459_v31, %s1323_s22 }
 0x163   :  { %588 = vrot.lane.b32.xlu0 %v1453_v23, %s1323_s22 }
 0x164   :  { %524 = vrot.lane.b32.xlu1 %v485_v42, %s1327_s10 }
 0x167   :  { %604 = vrot.lane.b32.xlu0 %v1456_v25, %s1323_s22 }
 0x168   :  { %540 = vrot.lane.b32.xlu1 %v509_v44, %s1327_s10 }
 0x16b   :  { %660 = vrot.lane.b32.xlu0 %v485_v42, %s1326_s1 }
 0x16c   :  { %658 = vrot.lane.b32.xlu1 %v482_v45, %s1326_s1 }
 0x16f   :  { %522 = vrot.lane.b32.xlu0 %v482_v45, %s1327_s10 }
 0x170   :  { %590 = vrot.lane.b32.xlu1 %v350_v52, %s1323_s22 }
 0x173   :  { %526 = vrot.lane.b32.xlu0 %v488_v58, %s1327_s10 }
 0x174   :  { %662 = vrot.lane.b32.xlu1 %v644_v59, %s1326_s1 }
 0x177   :  { %676 = vrot.lane.b32.xlu0 %v509_v44, %s1326_s1 }
 0x178   :  { %678 = vrot.lane.b32.xlu1 %v647_v43, %s1326_s1 }
 0x18d   :  { %v595_v60 = vpop.permute.xlu1 %594  ;;  %v577_v61 = vpop.permute.xlu0 %576 }
 0x191   :  { %v1521_v62 = vpop.permute.xlu0 %592 }
 0x192   :  { %v667_v63 = vpop.permute.xlu1 %666 }
 0x195   :  { %v513_v0 = vpop.permute.xlu0 %512 }
 0x196   :  { %v559_v1 = vadd.f32 %v1381_v26, %v513_v0  ;;  %v529_v4 = vpop.permute.xlu1 %528 }
 0x197   :  { %v567_v6 = vadd.f32 %v529_v4, %v1388_v29 }
 0x199   :  { %v633_v8 = vadd.f32 %v595_v60, %v567_v6  ;;  %v531_v9 = vpop.permute.xlu0 %530  ;;  %v1328_v60 = vmov 1983009808  }
 0x19a   :  { %v1526_v10 = vadd.f32 %v1383_v27, %v531_v9  ;;  %v599_v11 = vpop.permute.xlu1 %598 }
 0x19b   :  { %v705_v12 = vadd.f32 %v667_v63, %v633_v8  ;;  %v740_v63 = vlaneseq }
 0x19d   :  { %v649_v13 = vpop.permute.xlu0 %648  ;;  %v741_v9 = vshrl.u32 %v740_v63, 7 }
 0x19e   :  { %v579_v14 = vpop.permute.xlu1 %578 }
 0x19f   :  { %v625_v15 = vadd.f32 %v579_v14, %v559_v1 }
 0x1a1   :  { %v511_v16 = vpop.permute.xlu0 %510 }
 0x1a2   :  { %v558_v17 = vadd.f32 %v511_v16, %v1392_v30  ;;  %v517_v18 = vpop.permute.xlu1 %516  ;;  %v1539_v30 = vld [vmem:[%s1711_s2] ss:$0 sm:$0xff]  ;;  %s1330_s2 = smov [#allocation7]  }
 0x1a3   :  { %v561_v19 = vadd.f32 %v1406_v47, %v517_v18  ;;  %v1542_v38 = vadd.f32 %v1539_v30, %v705_v12  ;;  %s1079_s13 = sshll.u32 %s1330_s2, 4  ;;  %s1080_s13 = int_to_ptr.vmem [resolvable:$true] %s1079_s13 }
 0x1a4   :  { %v624_v26 = vadd.f32 %v577_v61, %v558_v17  ;;  %v738_v61 = vunpack.c.l.s4 %v1328_v60  ;;  %s1294_s14 = scalar_lea.vmem %s1080_s13, 512  ;;  %p1299_p3 = scmp.lt.s32.totalorder %s1080_s13, %s1080_s13 }
 0x1a5   :  { %v1530_v20 = vpop.permute.xlu0 %664  ;;  %p1295_p2 = scmp.ne.s32.totalorder %s1080_s13, %s1294_s14  ;;  %p1300_p4 = scmp.lt.s32.totalorder %s1294_s14, %s1294_s14 }
 0x1a6   :  { %v696_v29 = vadd.f32 %v649_v13, %v624_v26  ;;  %v671_v21 = vpop.permute.xlu1 %670  ;;  %v739_v8 = vunpack.c.0.s8 %v738_v61 }
 0x1a7   :  { %p1301_p5 = por %p1300_p4, %p1299_p3 }
 0x1a8   :  { %v719_v43 = vadd.f32 %v1539_v30, %v696_v29  ;;  %v1559_v17 = vsub.s32 %v739_v8, %v741_v9 }
 0x1a9   :  { %v581_v22 = vpop.permute.xlu0 %580  ;;  %p1302_p6 = pnand %p1301_p5, %p1295_p2 }
 0x1aa   :  { %v515_v24 = vpop.permute.xlu1 %514 }
 0x1ab   :  { %v560_v33 = vadd.f32 %v515_v24, %v1413_v51 }
 0x1ad   :  { %v1532_v27 = vpop.permute.xlu0 %596  ;;  %v626_v37 = vadd.f32 %v581_v22, %v560_v33 }
 0x1ae   :  { %v533_v28 = vpop.permute.xlu1 %532 }
 0x1af   :  { %v569_v32 = vadd.f32 %v533_v28, %v1410_v49 }
 0x1b1   :  { %v635_v34 = vadd.f32 %v599_v11, %v569_v32  ;;  %v535_v35 = vpop.permute.xlu0 %534 }
 0x1b2   :  { %v651_v47 = vpop.permute.xlu1 %650  ;;  %v570_v61 = vadd.f32 %v1404_v46, %v535_v35 }
 0x1b3   :  { %v707_v36 = vadd.f32 %v671_v21, %v635_v34  ;;  %v697_v0 = vadd.f32 %v651_v47, %v625_v15 }
 0x1b5   :  { %v1545_v39 = vadd.f32 %v1539_v30, %v707_v36  ;;  %v653_v40 = vpop.permute.xlu0 %652  ;;  %v720_v12 = vadd.f32 %v1539_v30, %v697_v0  ;;  %v634_v0 = vadd.f32 %v1532_v27, %v1526_v10 }
 0x1b6   :  { %v698_v49 = vadd.f32 %v653_v40, %v626_v37  ;;  %v603_v41 = vpop.permute.xlu1 %602 }
 0x1b7   :  { %v887_v51 = vcombine.low %v1542_v38, %v1545_v39  ;;  %v888_v42 = vcombine.high %v1542_v38, %v1545_v39 }
 0x1b8   :  { %v721_v44 = vadd.f32 %v1539_v30, %v698_v49 }
 0x1b9   :  { %v669_v45 = vpop.permute.xlu0 %668 }
 0x1ba   :  { %v735_v50 = vcombine.low %v719_v43, %v721_v44  ;;  %v736_v52 = vcombine.high %v719_v43, %v721_v44  ;;  %v583_v53 = vpop.permute.xlu1 %582  ;;  %v1329_v44 = vmov 1934713408  }
 0x1bb   :  { %v627_v1 = vadd.f32 %v583_v53, %v561_v19 }
 0x1bc   :  { %v1562_v29 = vrot.slane %v735_v50, %v1559_v17  ;;  %v1565_v15 = vrot.slane %v736_v52, %v1559_v17  ;;  %v802_v50 = vunpack.c.l.s4 %v1329_v44 }
 0x1bd   :  { %v585_v54 = vpop.permute.xlu0 %584 }
 0x1be   :  { %v521_v55 = vpop.permute.xlu1 %520 }
 0x1c1   :  { %v601_v56 = vpop.permute.xlu0 %600 }
 0x1c2   :  { %v675_v57 = vpop.permute.xlu1 %674  ;;  %v636_v8 = vadd.f32 %v601_v56, %v570_v61 }
 0x1c5   :  { %v1553_v58 = vpop.permute.xlu0 %538 }
 0x1c6   :  { %v537_v59 = vpop.permute.xlu1 %536 }
 0x1c7   :  { %v571_v40 = vadd.f32 %v537_v59, %v1437_v5  ;;  %v706_v5 = vadd.f32 %v669_v45, %v634_v0 }
 0x1c9   :  { %v657_v4 = vpop.permute.xlu0 %656  ;;  %v637_v53 = vadd.f32 %v603_v41, %v571_v40 }
 0x1ca   :  { %v655_v6 = vpop.permute.xlu1 %654 }
 0x1cb   :  { %v699_v11 = vadd.f32 %v655_v6, %v627_v1  ;;  %v803_v1 = vunpack.c.0.s8 %v802_v50  ;;  %v563_v6 = vadd.f32 %v1433_v3, %v521_v55  ;;  %v709_v59 = vadd.f32 %v675_v57, %v637_v53 }
 0x1cc   :  { %v1595_v3 = vrot.slane %v887_v51, %v1559_v17  ;;  %v572_v55 = vadd.f32 %v1431_v2, %v1553_v58 }
 0x1cd   :  { %v722_v13 = vadd.f32 %v1539_v30, %v699_v11  ;;  %v519_v14 = vpop.permute.xlu0 %518  ;;  %v1589_v35 = vsub.s32 %v803_v1, %v741_v9 }
 0x1ce   :  { %v1557_v16 = vpop.permute.xlu1 %606  ;;  %v562_v43 = vadd.f32 %v519_v14, %v1440_v7 }
 0x1cf   :  { %v751_v18 = vcombine.low %v720_v12, %v722_v13  ;;  %v752_v26 = vcombine.high %v720_v12, %v722_v13 }
 0x1d0   :  { %v628_v63 = vadd.f32 %v585_v54, %v562_v43  ;;  %v1602_v54 = vrot.slane %v888_v42, %v1559_v17 }
 0x1d1   :  { %v1568_v19 = vrot.slane %v751_v18, %v1559_v17  ;;  %v1571_v21 = vrot.slane %v752_v26, %v1559_v17  ;;  %v673_v22 = vpop.permute.xlu0 %672  ;;  %v732_v26 = vadd.f32 %v1539_v30, %v709_v59 }
 0x1d2   :  { %v587_v24 = vpop.permute.xlu1 %586  ;;  %v700_v13 = vadd.f32 %v657_v4, %v628_v63  ;;  %v708_v14 = vadd.f32 %v673_v22, %v636_v8 }
 0x1d3   :  { %v799_v28 = vcombine.low %v1562_v29, %v1568_v19  ;;  %v815_v32 = vcombine.low %v1565_v15, %v1571_v21  ;;  %v800_v33 = vcombine.high %v1562_v29, %v1568_v19  ;;  %v816_v34 = vcombine.high %v1565_v15, %v1571_v21 }
 0x1d4   :  { %v629_v41 = vadd.f32 %v587_v24, %v563_v6  ;;  %v731_v4 = vadd.f32 %v1539_v30, %v708_v14 }
 0x1d5   :  { %v589_v47 = vpop.permute.xlu0 %588  ;;  %v1614_v42 = vrot.slane %v799_v28, %v1589_v35  ;;  %v1620_v22 = vrot.slane %v815_v32, %v1589_v35  ;;  %v1624_v43 = vrot.slane %v800_v33, %v1589_v35  ;;  %v830_v33 = vrot.slane %v816_v34, %v1589_v35 }
 0x1d6   :  { %v525_v36 = vpop.permute.xlu1 %524 }
 0x1d7   :  { %v565_v18 = vadd.f32 %v1453_v23, %v525_v36  ;;  %v729_v23 = vadd.f32 %v1539_v30, %v706_v5 }
 0x1d9   :  { %v605_v37 = vpop.permute.xlu0 %604 }
 0x1da   :  { %v541_v49 = vpop.permute.xlu1 %540  ;;  %v638_v29 = vadd.f32 %v605_v37, %v572_v55 }
 0x1db   :  { %v573_v10 = vadd.f32 %v541_v49, %v1456_v25  ;;  %v723_v25 = vadd.f32 %v1539_v30, %v700_v13 }
 0x1dd   :  { %v661_v52 = vpop.permute.xlu0 %660  ;;  %v639_v19 = vadd.f32 %v1557_v16, %v573_v10 }
 0x1de   :  { %v659_v60 = vpop.permute.xlu1 %658 }
 0x1df   :  { %v701_v27 = vadd.f32 %v659_v60, %v629_v41 }
 0x1e1   :  { %v523_v11 = vpop.permute.xlu0 %522  ;;  %v724_v2 = vadd.f32 %v1539_v30, %v701_v27 }
 0x1e2   :  { %v564_v7 = vadd.f32 %v523_v11, %v1459_v31  ;;  %v591_v12 = vpop.permute.xlu1 %590 }
 0x1e3   :  { %v631_v45 = vadd.f32 %v591_v12, %v565_v18 }
 0x1e4   :  { %v630_v46 = vadd.f32 %v589_v47, %v564_v7 }
 0x1e5   :  { %v527_v31 = vpop.permute.xlu0 %526 }
 0x1e6   :  { %v702_v56 = vadd.f32 %v661_v52, %v630_v46  ;;  %v566_v51 = vadd.f32 %v1472_v48, %v527_v31  ;;  %v663_v57 = vpop.permute.xlu1 %662 }
 0x1e7   :  { %v703_v9 = vadd.f32 %v663_v57, %v631_v45 }
 0x1e8   :  { %v725_v38 = vadd.f32 %v1539_v30, %v702_v56  ;;  %v632_v39 = vadd.f32 %v1521_v62, %v566_v51 }
 0x1e9   :  { %v726_v48 = vadd.f32 %v1539_v30, %v703_v9  ;;  %v677_v58 = vpop.permute.xlu0 %676 }
 0x1ea   :  { %v767_v24 = vcombine.low %v723_v25, %v725_v38  ;;  %v768_v47 = vcombine.high %v723_v25, %v725_v38  ;;  %v704_v36 = vadd.f32 %v1530_v20, %v632_v39  ;;  %v710_v37 = vadd.f32 %v677_v58, %v638_v29  ;;  %v679_v40 = vpop.permute.xlu1 %678 }
 0x1eb   :  { %v783_v62 = vcombine.low %v724_v2, %v726_v48  ;;  %v784_v49 = vcombine.high %v724_v2, %v726_v48  ;;  %v711_v28 = vadd.f32 %v679_v40, %v639_v19 }
 0x1ec   :  { %v727_v44 = vadd.f32 %v1539_v30, %v704_v36  ;;  %v733_v50 = vadd.f32 %v1539_v30, %v710_v37  ;;  %v775_v16 = vrot.slane %v767_v24, %v1559_v17  ;;  %v782_v32 = vrot.slane %v768_v47, %v1559_v17 }
 0x1ed   :  { %v791_v52 = vrot.slane %v783_v62, %v1559_v17  ;;  %v798_v20 = vrot.slane %v784_v49, %v1559_v17  ;;  %v734_v53 = vadd.f32 %v1539_v30, %v711_v28 }
 0x1ee   :  { %v871_v60 = vcombine.low %v727_v44, %v729_v23  ;;  %v872_v61 = vcombine.high %v727_v44, %v729_v23  ;;  %v903_v63 = vcombine.low %v731_v4, %v733_v50  ;;  %v904_v0 = vcombine.high %v731_v4, %v733_v50 }
 0x1ef   :  { %v919_v1 = vcombine.low %v732_v26, %v734_v53  ;;  %v920_v6 = vcombine.high %v732_v26, %v734_v53  ;;  %v831_v8 = vcombine.low %v775_v16, %v791_v52  ;;  %v847_v11 = vcombine.low %v782_v32, %v798_v20 }
 0x1f0   :  { %v911_v5 = vrot.slane %v903_v63, %v1559_v17  ;;  %v918_v59 = vrot.slane %v904_v0, %v1559_v17  ;;  %v879_v7 = vrot.slane %v871_v60, %v1559_v17  ;;  %v832_v30 = vcombine.high %v775_v16, %v791_v52 }
 0x1f1   :  { %v927_v12 = vrot.slane %v919_v1, %v1559_v17  ;;  %v934_v15 = vrot.slane %v920_v6, %v1559_v17  ;;  %v839_v21 = vrot.slane %v831_v8, %v1589_v35  ;;  %v1644_v34 = vrot.slane %v847_v11, %v1589_v35 }
 0x1f2   :  { %v935_v13 = vcombine.low %v879_v7, %v1595_v3  ;;  %v846_v14 = vrot.slane %v832_v30, %v1589_v35  ;;  %v886_v41 = vrot.slane %v872_v61, %v1559_v17  ;;  %v848_v18 = vcombine.high %v782_v32, %v798_v20 }
 0x1f3   :  { %v864_v46 = vcombine.high %v1614_v42, %v839_v21  ;;  %v868_v10 = vcombine.high %v1620_v22, %v1644_v34  ;;  %v967_v27 = vcombine.low %v911_v5, %v927_v12  ;;  %v983_v45 = vcombine.low %v918_v59, %v934_v15 }
 0x1f4   :  { %v943_v31 = vrot.slane %v935_v13, %v1589_v35  ;;  %v865_v23 = vcombine.low %v1624_v43, %v846_v14  ;;  %v951_v55 = vcombine.low %v886_v41, %v1602_v54  ;;  %v862_v56 = vrot.slane %v848_v18, %v1589_v35 }
 0x1f5   :  { %1009 = vrot.lane.b32.xlu0 %v864_v46, %s1326_s1  ;;  %v975_v17 = vrot.slane %v967_v27, %v1589_v35  ;;  %v1659_v51 = vrot.slane %v983_v45, %v1589_v35  ;;  %v936_v57 = vcombine.high %v879_v7, %v1595_v3  ;;  %v968_v25 = vcombine.high %v911_v5, %v927_v12 }
 0x1f6   :  { %v959_v4 = vrot.slane %v951_v55, %v1589_v35  ;;  %v869_v9 = vcombine.low %v830_v33, %v862_v56  ;;  %v866_v26 = vcombine.high %v1624_v43, %v846_v14  ;;  %v952_v29 = vcombine.high %v886_v41, %v1602_v54 }
 0x1f7   :  { %v1000_v38 = vcombine.high %v943_v31, %v975_v17  ;;  %v950_v39 = vrot.slane %v936_v57, %v1589_v35  ;;  %v982_v2 = vrot.slane %v968_v25, %v1589_v35  ;;  %v984_v48 = vcombine.high %v918_v59, %v934_v15 }
 0x1f8   :  { %v1004_v58 = vcombine.high %v959_v4, %v1659_v51  ;;  %v966_v19 = vrot.slane %v952_v29, %v1589_v35  ;;  %v870_v24 = vcombine.high %v830_v33, %v862_v56  ;;  %v863_v3 = vcombine.low %v1614_v42, %v839_v21 }
 0x1f9   :  { %1033 = vrot.lane.b32.xlu0 %v868_v10, %s1326_s1  ;;  %1011 = vrot.lane.b32.xlu1 %v1000_v38, %s1326_s1  ;;  %v1001_v47 = vcombine.low %v950_v39, %v982_v2  ;;  %v998_v54 = vrot.slane %v984_v48, %v1589_v35  ;;  %v1002_v36 = vcombine.high %v950_v39, %v982_v2 }
 0x1fa   :  { %v867_v37 = vcombine.low %v1620_v22, %v1644_v34  ;;  %v999_v40 = vcombine.low %v943_v31, %v975_v17  ;;  %v1003_v62 = vcombine.low %v959_v4, %v1659_v51 }
 0x1fb   :  { %v1005_v49 = vcombine.low %v966_v19, %v998_v54  ;;  %v1006_v28 = vcombine.high %v966_v19, %v998_v54 }
 0x1fd   :  { %1017 = vrot.lane.b32.xlu0 %v865_v23, %s1323_s22  ;;  %1035 = vrot.lane.b32.xlu1 %v1004_v58, %s1326_s1 }
 0x201   :  { %1041 = vrot.lane.b32.xlu0 %v869_v9, %s1323_s22  ;;  %1019 = vrot.lane.b32.xlu1 %v1001_v47, %s1323_s22 }
 0x205   :  { %1025 = vrot.lane.b32.xlu0 %v866_v26, %s1327_s10  ;;  %1043 = vrot.lane.b32.xlu1 %v1005_v49, %s1323_s22 }
 0x209   :  { %1049 = vrot.lane.b32.xlu0 %v870_v24, %s1327_s10  ;;  %1027 = vrot.lane.b32.xlu1 %v1002_v36, %s1327_s10 }
 0x20d   :  { %1051 = vrot.lane.b32.xlu1 %v1006_v28, %s1327_s10 }
 0x267   :  { %v1010_v35 = vpop.permute.xlu0 %1009 }
 0x268   :  { %v1056_v32 = vsel %vm1055_vm1, %v863_v3, %v1010_v35 }
 0x26b   :  { %v1034_v42 = vpop.permute.xlu0 %1033  ;;  %v1012_v22 = vpop.permute.xlu1 %1011 }
 0x26c   :  { %v1064_v60 = vsel %vm1055_vm1, %v867_v37, %v1034_v42  ;;  %v1057_v61 = vsel %vm1055_vm1, %v999_v40, %v1012_v22 }
 0x26f   :  { %v1018_v43 = vpop.permute.xlu0 %1017  ;;  %v1036_v44 = vpop.permute.xlu1 %1035 }
 0x270   :  { %v1059_v52 = vsel %vm1058_vm2, %v1056_v32, %v1018_v43  ;;  %v1065_v5 = vsel %vm1055_vm1, %v1003_v62, %v1036_v44 }
 0x273   :  { %v1042_v50 = vpop.permute.xlu0 %1041  ;;  %v1020_v16 = vpop.permute.xlu1 %1019 }
 0x274   :  { %v1066_v63 = vsel %vm1058_vm2, %v1064_v60, %v1042_v50  ;;  %v1060_v0 = vsel %vm1058_vm2, %v1057_v61, %v1020_v16 }
 0x277   :  { %v1026_v20 = vpop.permute.xlu0 %1025  ;;  %v1044_v53 = vpop.permute.xlu1 %1043 }
 0x278   :  { %v1062_v33 = vsel %vm1061_vm3, %v1059_v52, %v1026_v20  ;;  %v1067_v59 = vsel %vm1058_vm2, %v1065_v5, %v1044_v53 }
 0x279   :  { %1070 = vst [vmem:[#allocation7] sm:$0xff] %v1062_v33 }
 0x27b   :  { %v1050_v1 = vpop.permute.xlu0 %1049  ;;  %v1028_v6 = vpop.permute.xlu1 %1027 }
 0x27c   :  { %v1068_v8 = vsel %vm1061_vm3, %v1066_v63, %v1050_v1  ;;  %v1063_v11 = vsel %vm1061_vm3, %v1060_v0, %v1028_v6 }
 0x27d   :  { %1071 = vst [vmem:[#allocation7 + $0x8] sm:$0xff] %v1068_v8  ;;  %1072 = vst [vmem:[#allocation7 + $0x10] sm:$0xff] %v1063_v11 }
 0x27f   :  { %v1052_v7 = vpop.permute.xlu1 %1051 }
 0x280   :  { %v1069_v30 = vsel %vm1061_vm3, %v1067_v59, %v1052_v7 }
 0x281   :  { %1073 = vst [vmem:[#allocation7 + $0x18] sm:$0xff] %v1069_v30 }
 0x282   :  { %1305 = shalt.err (!%p1302_p6)
}
 0x283   :  { %s1306_s17 = scalar_lea.hbm %s1712_s3, 512 }
 0x284   :  { %p1307_p7 = scmp.ne.s32.totalorder %s1712_s3, %s1306_s17  ;;  %p1310_p8 = scmp.lt.u32.totalorder %s1306_s17, %s1712_s3 }
 0x286   :  { %p1312_p9 = pnand %p1310_p8, %p1307_p7 }
 0x288   :  { %1315 = shalt.err (!%p1312_p9)
}
 0x289   :  { %s1331_s22 = smov 256   ;;  %s1332_s23 = smov 16  }
 0x28a   :  { %1085 = dma.vmem_to_hbm [thread:$0]  %s1080_s13, 512, %s1712_s3, [#allocation4], %s1331_s22, %s1331_s22, %s1332_s23  }
 0x28b   :  { %1320 = dma.done.wait [#allocation4], 512  }
 0x28c   :  { %1321 = vsyncadd [#allocation4], 4294966784 }
 0x28d   :  { %1089 = vsyncpa [#allocation3], 1 }
 0x28e   :  { %1090 = vsyncpa [#allocation6], 1 }
 0x28f   :  { %1091 = vsyncpa [#allocation4], 1 }

// kernel: tpu_custom_call.1
= control target key start
LH: loop header
LB: loop body
LE: loop exit
PB: predicated region body
PF: predicated region fallthrough
CT: control target
= control target key end

     0   :  { %vm68_vm0 = vsmask.f32 3328  ;;  %vm69_vm1 = vsmask.f32 7440  ;;  %s2053_s0 = inlined_call_operand.vmem [shape: bf16[2,9,16,128], index: 0, kind: input, shape index: {}]   ;;  %s2054_s1 = inlined_call_operand.vmem [shape: bf16[4,128,32], index: 1, kind: input, shape index: {}]   ;;  %s2055_s2 = inlined_call_operand.vmem [shape: f32[1,32], index: 2, kind: input, shape index: {}]   ;;  %s2056_s3 = inlined_call_operand.hbm [shape: f32[2,8,8,32], index: 3, kind: output, shape index: {}]  }
   0x1   :  { %v1516_v0 = vld [vmem:[%s2054_s1 + $0x40] sm:$0xff]   ;;  %v1518_v2 = vld [vmem:[%s2054_s1 + $0x48] sm:$0xff]   ;;  %v1520_v4 = vld [vmem:[%s2054_s1 + $0x50] sm:$0xff]  }
   0x2   :  { %v1517_v1 = vld [vmem:[%s2054_s1 + $0x80] sm:$0xff]   ;;  %1337 = vmatprep.subr.bf16.mxu1 %v1516_v0  ;;  %v1519_v3 = vld [vmem:[%s2054_s1 + $0x88] sm:$0xff]   ;;  %v1521_v5 = vld [vmem:[%s2054_s1 + $0x90] sm:$0xff]  }
   0x3   :  { %1401 = vmatprep.subr.bf16.mxu0 %v1517_v1  ;;  %1338 = vmatpush3.bf16.msra.mxu1 %v1516_v0  ;;  %v1522_v6 = vld [vmem:[%s2054_s1 + $0x58] sm:$0xff]   ;;  %v1524_v8 = vld [vmem:[%s2054_s1 + $0x60] sm:$0xff]   ;;  %v1526_v10 = vld [vmem:[%s2054_s1 + $0x68] sm:$0xff]  }
   0x4   :  { %1402 = vmatpush3.bf16.msra.mxu0 %v1517_v1  ;;  %1339 = vmatprep.subr.bf16.mxu1 %v1518_v2  ;;  %v1523_v7 = vld [vmem:[%s2054_s1 + $0x98] sm:$0xff]   ;;  %v1525_v9 = vld [vmem:[%s2054_s1 + $0xa0] sm:$0xff]   ;;  %v1527_v11 = vld [vmem:[%s2054_s1 + $0xa8] sm:$0xff]  }
   0x5   :  { %1403 = vmatprep.subr.bf16.mxu0 %v1519_v3  ;;  %v1650_v12 = vld [vmem:[%s2053_s0] sm:$0xf]  ;;  %v17_v13 = vld [vmem:[%s2053_s0 + $0x4] sm:$0xf]  ;;  %v1658_v14 = vld [vmem:[%s2053_s0 + $0x8] sm:$0xf] }
   0x6   :  { %v19_v15 = vld [vmem:[%s2053_s0 + $0xc] sm:$0xf]  ;;  %v1666_v16 = vld [vmem:[%s2053_s0 + $0x10] sm:$0xf]  ;;  %v21_v17 = vld [vmem:[%s2053_s0 + $0x14] sm:$0xf] }
   0x7   :  { %1340 = vmatpush3.bf16.msra.mxu1 %v1518_v2  ;;  %v1528_v18 = vld [vmem:[%s2054_s1 + $0x70] sm:$0xff]   ;;  %v72_v19 = vshrl.u32 %v1650_v12, 16  ;;  %v75_v20 = vshll.u32 %v1650_v12, 16  ;;  %v81_v22 = vshll.u32 %v17_v13, 16  ;;  %v86_v23 = vshrl.u32 %v1658_v14, 16  ;;  %v1530_v36 = vld [vmem:[%s2054_s1 + $0x78] sm:$0xff]   ;;  %vm1696_vm2 = vmor %vm68_vm0, %vm69_vm1 }
   0x8   :  { %1404 = vmatpush3.bf16.msra.mxu0 %v1519_v3  ;;  %1341 = vmatprep.subr.bf16.mxu1 %v1520_v4  ;;  %v1529_v21 = vld [vmem:[%s2054_s1 + $0xb0] sm:$0xff]   ;;  %v89_v24 = vshll.u32 %v1658_v14, 16  ;;  %v95_v25 = vshll.u32 %v19_v15, 16  ;;  %v1684_v26 = vld [vmem:[%s2053_s0 + $0x18] sm:$0xf]  ;;  %v100_v29 = vshrl.u32 %v1666_v16, 16  ;;  %v1224_v43 = vcombine.low %v1658_v14, %v1666_v16 }
   0x9   :  { %1405 = vmatprep.subr.bf16.mxu0 %v1521_v5  ;;  %v74_v27 = vrot.slane %v72_v19, 4  ;;  %v77_v28 = vrot.slane %v75_v20, 5  ;;  %v103_v30 = vshll.u32 %v1666_v16, 16  ;;  %v23_v31 = vld [vmem:[%s2053_s0 + $0x1c] sm:$0xf]  ;;  %v83_v32 = vrot.slane %v81_v22, 5 }
   0xa   :  { %v88_v33 = vrot.slane %v86_v23, 4  ;;  %v91_v34 = vrot.slane %v89_v24, 5  ;;  %v97_v35 = vrot.slane %v95_v25, 5  ;;  %v102_v38 = vrot.slane %v100_v29, 4  ;;  %v1707_v46 = vld [vmem:[%s2053_s0 + $0x20] sm:$0xf]  ;;  %1417 = vmatprep.mubr.bf16.mxu0 %v1224_v43 }
   0xb   :  { %1342 = vmatpush3.bf16.msra.mxu1 %v1520_v4  ;;  %v78_v37 = vor.u32 %v77_v28, %v74_v27  ;;  %v105_v39 = vrot.slane %v103_v30, 5  ;;  %v109_v40 = vshll.u32 %v21_v17, 16  ;;  %v114_v44 = vshrl.u32 %v1684_v26, 16  ;;  %v1531_v47 = vld [vmem:[%s2054_s1 + $0xb8] sm:$0xff]   ;;  %v1533_v58 = vld [vmem:[%s2054_s1] sm:$0xff]   ;;  %v1536_v27 = vld [vmem:[%s2054_s1 + $0x8] sm:$0xff]  }
   0xc   :  { %1406 = vmatpush3.bf16.msra.mxu0 %v1521_v5  ;;  %1343 = vmatprep.subr.bf16.mxu1 %v1522_v6  ;;  %v92_v42 = vor.u32 %v91_v34, %v88_v33  ;;  %v117_v45 = vshll.u32 %v1684_v26, 16  ;;  %v123_v51 = vshll.u32 %v23_v31, 16  ;;  %v128_v55 = vshrl.u32 %v1707_v46, 16  ;;  %v25_v2 = vld [vmem:[%s2053_s0 + $0x24] sm:$0xf]  ;;  %v1537_v31 = vld [vmem:[%s2054_s1 + $0xc8] sm:$0xff]  }
   0xd   :  { %1407 = vmatprep.subr.bf16.mxu0 %v1523_v7  ;;  %v79_v48 = vrot.slane %v78_v37, 4  ;;  %v106_v49 = vor.u32 %v105_v39, %v102_v38  ;;  %v111_v50 = vrot.slane %v109_v40, 5  ;;  %v116_v53 = vrot.slane %v114_v44, 4  ;;  %v1732_v3 = vld [vmem:[%s2053_s0 + $0x28] sm:$0xf] }
   0xe   :  { %v93_v52 = vrot.slane %v92_v42, 4  ;;  %v119_v54 = vrot.slane %v117_v45, 5  ;;  %v131_v59 = vshll.u32 %v1707_v46, 16  ;;  %v125_v62 = vrot.slane %v123_v51, 5  ;;  %v27_v4 = vld [vmem:[%s2053_s0 + $0x2c] sm:$0xf] }
   0xf   :  { %1344 = vmatpush3.bf16.msra.mxu1 %v1522_v6  ;;  %v84_v56 = vsel %vm1696_vm2, %v79_v48, %v83_v32  ;;  %v107_v57 = vrot.slane %v106_v49, 4  ;;  %v130_v63 = vrot.slane %v128_v55, 4  ;;  %v1225_v1 = vcombine.low %v1684_v26, %v1707_v46  ;;  %v1763_v23 = vld [vmem:[%s2053_s0 + $0x38] sm:$0xf]  ;;  %v31_v24 = vld [vmem:[%s2053_s0 + $0x3c] sm:$0xf] }
  0x10   :  { %1408 = vmatpush3.bf16.msra.mxu0 %v1523_v7  ;;  %1345 = vmatprep.subr.bf16.mxu1 %v1524_v8  ;;  %v1721_v60 = vsel %vm1696_vm2, %v93_v52, %v97_v35  ;;  %v120_v61 = vor.u32 %v119_v54, %v116_v53  ;;  %v1535_v7 = vld [vmem:[%s2054_s1 + $0xc0] sm:$0xff]   ;;  %v145_v13 = vshll.u32 %v1732_v3, 16  ;;  %v151_v15 = vshll.u32 %v27_v4, 16  ;;  %v1539_v49 = vld [vmem:[%s2054_s1 + $0x10] sm:$0xff]  }
  0x11   :  { %1409 = vmatprep.subr.bf16.mxu0 %v1525_v9  ;;  %v1176_v0 = vcombine.low %v84_v56, %v1721_v60  ;;  %v1739_v5 = vsel %vm1696_vm2, %v107_v57, %v111_v50  ;;  %v170_v38 = vshrl.u32 %v1763_v23, 16  ;;  %v173_v39 = vshll.u32 %v1763_v23, 16  ;;  %v32_v40 = vld [vmem:[%s2053_s0 + $0x40] sm:$0xf]  ;;  %v1541_v53 = vld [vmem:[%s2054_s1 + $0xd0] sm:$0xff]   ;;  %v1542_v57 = vld [vmem:[%s2054_s1 + $0x18] sm:$0xff]  }
  0x12   :  { %v121_v6 = vrot.slane %v120_v61, 4  ;;  %v147_v29 = vrot.slane %v145_v13, 5  ;;  %v153_v30 = vrot.slane %v151_v15, 5  ;;  %v179_v43 = vshll.u32 %v31_v24, 16  ;;  %v39_v24 = vld [vmem:[%s2053_s0 + $0x5c] sm:$0xf] }
  0x13   :  { %1346 = vmatpush3.bf16.msra.mxu1 %v1524_v8  ;;  %v133_v8 = vrot.slane %v131_v59, 5  ;;  %1353 = vmatprep.mubr.bf16.mxu1 %v1176_v0  ;;  %v172_v48 = vrot.slane %v170_v38, 4  ;;  %v175_v51 = vrot.slane %v173_v39, 5  ;;  %v881_v52 = vshrl.u32 %v32_v40, 16  ;;  %v1811_v0 = vld [vmem:[%s2053_s0 + $0x48] sm:$0xf] }
  0x14   :  { %1410 = vmatpush3.bf16.msra.mxu0 %v1525_v9  ;;  %1347 = vmatprep.subr.bf16.mxu1 %v1526_v10  ;;  %v137_v9 = vshll.u32 %v25_v2, 16  ;;  %v1757_v19 = vsel %vm1696_vm2, %v121_v6, %v125_v62  ;;  %v1227_v55 = vcombine.low %v1763_v23, %v32_v40  ;;  %v884_v56 = vshll.u32 %v32_v40, 16  ;;  %v1825_v6 = vld [vmem:[%s2053_s0 + $0x50] sm:$0xf] }
  0x15   :  { %1411 = vmatprep.subr.bf16.mxu0 %v1527_v11  ;;  %v134_v20 = vor.u32 %v133_v8, %v130_v63  ;;  %v1177_v25 = vcombine.low %v1739_v5, %v1757_v19  ;;  %v176_v59 = vor.u32 %v175_v51, %v172_v48  ;;  %v181_v61 = vrot.slane %v179_v43, 5  ;;  %v1543_v63 = vld [vmem:[%s2054_s1 + $0xd8] sm:$0xff]  }
  0x16   :  { %v1803_v62 = vrot.slane %v881_v52, 4  ;;  %v1820_v4 = vrot.slane %v884_v56, 5  ;;  %v184_v8 = vshrl.u32 %v1811_v0, 16  ;;  %v198_v15 = vshrl.u32 %v1825_v6, 16 }
  0x17   :  { %1348 = vmatpush3.bf16.msra.mxu1 %v1526_v10  ;;  %v1747_v10 = vld [vmem:[%s2053_s0 + $0x30] sm:$0xf]  ;;  %v135_v32 = vrot.slane %v134_v20, 4  ;;  %v201_v20 = vshll.u32 %v1825_v6, 16 }
  0x18   :  { %1412 = vmatpush3.bf16.msra.mxu0 %v1527_v11  ;;  %1349 = vmatprep.subr.bf16.mxu1 %v1528_v18  ;;  %v142_v11 = vshrl.u32 %v1732_v3, 16  ;;  %v156_v17 = vshrl.u32 %v1747_v10, 16  ;;  %v159_v22 = vshll.u32 %v1747_v10, 16  ;;  %v1226_v33 = vcombine.low %v1732_v3, %v1747_v10 }
  0x19   :  { %1413 = vmatprep.subr.bf16.mxu0 %v1529_v21 }
  0x1a   :  { %v144_v28 = vrot.slane %v142_v11, 4  ;;  %v158_v34 = vrot.slane %v156_v17, 4  ;;  %v161_v35 = vrot.slane %v159_v22, 5  ;;  %v187_v11 = vshll.u32 %v1811_v0, 16  ;;  %v1836_v17 = vld [vmem:[%s2053_s0 + $0x58] sm:$0xf] }
  0x1b   :  { %1350 = vmatpush3.bf16.msra.mxu1 %v1528_v18  ;;  %v29_v18 = vld [vmem:[%s2053_s0 + $0x34] sm:$0xf]  ;;  %v212_v22 = vshrl.u32 %v1836_v17, 16  ;;  %v1228_v39 = vcombine.low %v1825_v6, %v1836_v17 }
  0x1c   :  { %1414 = vmatpush3.bf16.msra.mxu0 %v1529_v21  ;;  %1351 = vmatprep.subr.bf16.mxu1 %v1530_v36  ;;  %v139_v21 = vrot.slane %v137_v9, 5  ;;  %v165_v37 = vshll.u32 %v29_v18, 16  ;;  %v162_v42 = vor.u32 %v161_v35, %v158_v34  ;;  %v177_v9 = vrot.slane %v176_v59, 4 }
  0x1d   :  { %1415 = vmatprep.subr.bf16.mxu0 %v1531_v47  ;;  %v186_v18 = vrot.slane %v184_v8, 4  ;;  %v215_v35 = vshll.u32 %v1836_v17, 16  ;;  %v214_v40 = vrot.slane %v212_v22, 4  ;;  %v43_v22 = vld [vmem:[%s2053_s0 + $0x6c] sm:$0xf] }
  0x1e   :  { %v1785_v44 = vsel %vm1696_vm2, %v135_v32, %v139_v21  ;;  %v163_v50 = vrot.slane %v162_v42, 4  ;;  %v221_v42 = vshll.u32 %v39_v24, 16  ;;  %v1901_v24 = vld [vmem:[%s2053_s0 + $0x70] sm:$0xf] }
  0x1f   :  { %1352 = vmatpush3.bf16.msra.mxu1 %v1530_v36  ;;  %v148_v36 = vor.u32 %v147_v29, %v144_v28  ;;  %v200_v29 = vrot.slane %v198_v15, 4 }
  0x20   :  { %1416 = vmatpush3.bf16.msra.mxu0 %v1531_v47  ;;  %1369 = vmatprep.subr.bf16.mxu1 %v1533_v58  ;;  %v167_v47 = vrot.slane %v165_v37, 5  ;;  %v1547_v37 = vld [vmem:[%s2054_s1 + $0xe0] sm:$0xff]   ;;  %v223_v52 = vrot.slane %v221_v42, 5 }
  0x21   :  { %1433 = vmatprep.subr.bf16.mxu0 %v1535_v7  ;;  %v149_v45 = vrot.slane %v148_v36, 4  ;;  %v41_v36 = vld [vmem:[%s2053_s0 + $0x64] sm:$0xf] }
  0x22   :  { %1354 = vmatmul.mubr.bf16.vlgmr.msra.gmra.mrb[0].mxu1 %v1177_v25  ;;  %v1818_v2 = vsel %vm1696_vm2, %v163_v50, %v167_v47  ;;  %v1845_v25 = vsel %vm1696_vm2, %v177_v9, %v181_v61  ;;  %v1548_v50 = vld [vmem:[%s2054_s1 + $0x28] sm:$0xff]  }
  0x23   :  { %1418 = vmatmul.mubr.bf16.vlgmr.msra.gmra.mrb[0].mxu0 %v1225_v1  ;;  %1370 = vmatpush3.bf16.msra.mxu1 %v1533_v58  ;;  %v1795_v54 = vsel %vm1696_vm2, %v149_v45, %v153_v30  ;;  %v35_v1 = vld [vmem:[%s2053_s0 + $0x4c] sm:$0xf]  ;;  %v1850_v30 = vld [vmem:[%s2053_s0 + $0x60] sm:$0xf]  ;;  %v1179_v32 = vcombine.low %v1818_v2, %v1845_v25  ;;  %v217_v45 = vrot.slane %v215_v35, 5  ;;  %v254_v35 = vshrl.u32 %v1901_v24, 16 }
  0x24   :  { %1434 = vmatpush3.bf16.msra.mxu0 %v1535_v7  ;;  %1371 = vmatprep.subr.bf16.mxu1 %v1536_v27  ;;  %v1178_v58 = vcombine.low %v1785_v44, %v1795_v54  ;;  %v37_v7 = vld [vmem:[%s2053_s0 + $0x54] sm:$0xf]  ;;  %v193_v13 = vshll.u32 %v35_v1, 16  ;;  %v226_v47 = vshrl.u32 %v1850_v30, 16  ;;  %v229_v48 = vshll.u32 %v1850_v30, 16  ;;  %v1549_v1 = vld [vmem:[%s2054_s1 + $0xe8] sm:$0xff]  }
  0x25   :  { %1435 = vmatprep.subr.bf16.mxu0 %v1537_v31  ;;  %1421 = vmatprep.mubr.bf16.mxu0 %v1226_v33  ;;  %v207_v21 = vshll.u32 %v37_v7, 16  ;;  %v203_v33 = vrot.slane %v201_v20, 5  ;;  %v1256_v20 = vcombine.low %v1721_v60, %v1739_v5 }
  0x26   :  { %1357 = vmatprep.mubr.bf16.mxu1 %v1178_v58  ;;  %v195_v28 = vrot.slane %v193_v13, 5  ;;  %v218_v58 = vor.u32 %v217_v45, %v214_v40  ;;  %v228_v59 = vrot.slane %v226_v47, 4  ;;  %v231_v61 = vrot.slane %v229_v48, 5  ;;  %v1932_v47 = vld [vmem:[%s2053_s0 + $0x80] sm:$0xf] }
  0x27   :  { %1372 = vmatpush3.bf16.msra.mxu1 %v1536_v27  ;;  %v189_v27 = vrot.slane %v187_v11, 5  ;;  %v209_v34 = vrot.slane %v207_v21, 5  ;;  %v204_v43 = vor.u32 %v203_v33, %v200_v29  ;;  %v1913_v33 = vld [vmem:[%s2053_s0 + $0x78] sm:$0xf]  ;;  %v49_v48 = vld [vmem:[%s2053_s0 + $0x84] sm:$0xf] }
  0x28   :  { %1436 = vmatpush3.bf16.msra.mxu0 %v1537_v31  ;;  %1373 = vmatprep.subr.bf16.mxu1 %v1539_v49  ;;  %v1545_v31 = vld [vmem:[%s2054_s1 + $0x20] sm:$0xff]   ;;  %v219_v11 = vrot.slane %v218_v58, 4  ;;  %v232_v13 = vor.u32 %v231_v61, %v228_v59  ;;  %v271_v45 = vshll.u32 %v1913_v33, 16  ;;  %v1230_v58 = vcombine.low %v1901_v24, %v1913_v33 }
  0x29   :  { %1437 = vmatprep.subr.bf16.mxu0 %v1541_v53  ;;  %v190_v38 = vor.u32 %v189_v27, %v186_v18  ;;  %v205_v56 = vrot.slane %v204_v43, 4  ;;  %v1551_v18 = vld [vmem:[%s2054_s1 + $0x30] sm:$0xff]  }
  0x2a   :  { %1358 = vmatmul.mubr.bf16.gmra.mrb[4].mxu1 %v1179_v32  ;;  %v45_v27 = vld [vmem:[%s2053_s0 + $0x74] sm:$0xf]  ;;  %v233_v29 = vrot.slane %v232_v13, 4  ;;  %v249_v32 = vshll.u32 %v43_v22, 16  ;;  %v273_v61 = vrot.slane %v271_v45, 5  ;;  %v1555_v22 = vld [vmem:[%s2054_s1 + $0xf8] sm:$0xff]  }
  0x2b   :  { %1422 = vmatmul.mubr.bf16.gmra.mrb[4].mxu0 %v1227_v55  ;;  %1374 = vmatpush3.bf16.msra.mxu1 %v1539_v49  ;;  %v1871_v49 = vld [vmem:[%s2053_s0 + $0x68] sm:$0xf]  ;;  %v191_v51 = vrot.slane %v190_v38, 4  ;;  %v263_v38 = vshll.u32 %v45_v27, 16 }
  0x2c   :  { %1438 = vmatpush3.bf16.msra.mxu0 %v1541_v53  ;;  %1375 = vmatprep.subr.bf16.mxu1 %v1542_v57  ;;  %v235_v53 = vshll.u32 %v41_v36, 16  ;;  %v240_v55 = vshrl.u32 %v1871_v49, 16  ;;  %v243_v8 = vshll.u32 %v1871_v49, 16  ;;  %v1229_v9 = vcombine.low %v1850_v30, %v1871_v49 }
  0x2d   :  { %1439 = vmatprep.subr.bf16.mxu0 %v1543_v63  ;;  %1425 = vmatprep.mubr.bf16.mxu0 %v1228_v39  ;;  %v196_v7 = vsel %vm1696_vm2, %v191_v51, %v195_v28  ;;  %v1908_v28 = vsel %vm1696_vm2, %v219_v11, %v223_v52  ;;  %v257_v36 = vshll.u32 %v1901_v24, 16  ;;  %v47_v39 = vld [vmem:[%s2053_s0 + $0x7c] sm:$0xf]  ;;  %v251_v43 = vrot.slane %v249_v32, 5 }
  0x2e   :  { %v242_v15 = vrot.slane %v240_v55, 4  ;;  %v256_v52 = vrot.slane %v254_v35, 4  ;;  %v265_v55 = vrot.slane %v263_v38, 5 }
  0x2f   :  { %1376 = vmatpush3.bf16.msra.mxu1 %v1542_v57  ;;  %v237_v57 = vrot.slane %v235_v53, 5  ;;  %v259_v53 = vrot.slane %v257_v36, 5 }
  0x30   :  { %1440 = vmatpush3.bf16.msra.mxu0 %v1543_v63  ;;  %1377 = vmatprep.subr.bf16.mxu1 %v1545_v31  ;;  %v1887_v63 = vsel %vm1696_vm2, %v205_v56, %v209_v34  ;;  %v1553_v34 = vld [vmem:[%s2054_s1 + $0xf0] sm:$0xff]  }
  0x31   :  { %1441 = vmatprep.subr.bf16.mxu0 %v1547_v37  ;;  %v1180_v21 = vcombine.low %v196_v7, %v1887_v63  ;;  %v1926_v40 = vsel %vm1696_vm2, %v233_v29, %v237_v57  ;;  %v1554_v7 = vld [vmem:[%s2054_s1 + $0x38] sm:$0xff]   ;;  %v260_v57 = vor.u32 %v259_v53, %v256_v52 }
  0x32   :  { %v1181_v51 = vcombine.low %v1908_v28, %v1926_v40 }
  0x33   :  { %1426 = vmatmul.mubr.bf16.gmra.mrb[8].mxu0 %v1229_v9  ;;  %1378 = vmatpush3.bf16.msra.mxu1 %v1545_v31  ;;  %v245_v31 = vrot.slane %v243_v8, 5  ;;  %v277_v8 = vshll.u32 %v47_v39, 16  ;;  %v285_v9 = vshll.u32 %v1932_v47, 16  ;;  %v261_v27 = vrot.slane %v260_v57, 4  ;;  %v33_v39 = vld [vmem:[%s2053_s0 + $0x44] sm:$0xf] }
  0x34   :  { %1442 = vmatpush3.bf16.msra.mxu0 %v1547_v37  ;;  %1379 = vmatprep.subr.bf16.mxu1 %v1548_v50  ;;  %v268_v37 = vshrl.u32 %v1913_v33, 16 }
  0x35   :  { %1361 = vmatprep.mubr.bf16.mxu1 %v1180_v21  ;;  %1443 = vmatprep.subr.bf16.mxu0 %v1549_v1  ;;  %v246_v42 = vor.u32 %v245_v31, %v242_v15  ;;  %v291_v15 = vshll.u32 %v49_v48, 16  ;;  %v279_v29 = vrot.slane %v277_v8, 5  ;;  %v287_v32 = vrot.slane %v285_v9, 5 }
  0x36   :  { %v270_v59 = vrot.slane %v268_v37, 4  ;;  %1362 = vmatmul.mubr.bf16.gmra.mrb[8].mxu1 %v1181_v51  ;;  %1429 = vmatprep.mubr.bf16.mxu0 %v1230_v58  ;;  %v266_v38 = vsel %vm1696_vm2, %v261_v27, %v265_v55 }
  0x37   :  { %1380 = vmatpush3.bf16.msra.mxu1 %v1548_v50  ;;  %v247_v56 = vrot.slane %v246_v42, 4  ;;  %v282_v50 = vshrl.u32 %v1932_v47, 16  ;;  %v293_v36 = vrot.slane %v291_v15, 5 }
  0x38   :  { %1444 = vmatpush3.bf16.msra.mxu0 %v1549_v1  ;;  %1381 = vmatprep.subr.bf16.mxu1 %v1551_v18  ;;  %v50_v1 = vld [vmem:[%s2053_s0 + $0x88] sm:$0xf]  ;;  %v274_v13 = vor.u32 %v273_v61, %v270_v59 }
  0x39   :  { %1445 = vmatprep.subr.bf16.mxu0 %v1553_v34  ;;  %v1951_v11 = vsel %vm1696_vm2, %v247_v56, %v251_v43  ;;  %v1231_v21 = vcombine.low %v1932_v47, %v50_v1  ;;  %v284_v31 = vrot.slane %v282_v50, 4 }
  0x3a   :  { %v275_v35 = vrot.slane %v274_v13, 4  ;;  %v1182_v42 = vcombine.low %v1951_v11, %v266_v38 }
  0x3b   :  { %1382 = vmatpush3.bf16.msra.mxu1 %v1551_v18  ;;  %1430 = vmatmul.mubr.bf16.gmra.mrb[12].mxu0 %v1231_v21  ;;  %v288_v37 = vor.u32 %v287_v32, %v284_v31  ;;  %v887_v18 = vor.u32 %v1820_v4, %v1803_v62 }
  0x3c   :  { %1383 = vmatprep.subr.bf16.mxu1 %v1554_v7  ;;  %1446 = vmatpush3.bf16.msra.mxu0 %v1553_v34 }
  0x3d   :  { %1449 = vmatprep.mubr.bf16.mxu0 %v1256_v20  ;;  %1447 = vmatprep.subr.bf16.mxu0 %v1555_v22 }
  0x3e   :  { %8 = vsyncpa [#allocation3], 0  ;;  %v280_v43 = vsel %vm1696_vm2, %v275_v35, %v279_v29  ;;  %v289_v45 = vrot.slane %v288_v37, 4  ;;  %v890_v34 = vshll.u32 %v33_v39, 16  ;;  %v1257_v60 = vcombine.low %v1757_v19, %v1785_v44  ;;  %1365 = vmatprep.mubr.bf16.mxu1 %v1182_v42  ;;  %v51_v56 = vld [vmem:[%s2053_s0 + $0x8c] sm:$0xf] }
  0x3f   :  { %1384 = vmatpush3.bf16.msra.mxu1 %v1554_v7  ;;  %v1192_v5 = vcombine.low %v1650_v12, %v1658_v14  ;;  %v1258_v4 = vcombine.low %v1795_v54, %v1818_v2  ;;  %v888_v20 = vrot.slane %v887_v18, 4  ;;  %v895_v52 = vshrl.u32 %v50_v1, 16 }
  0x40   :  { %v294_v62 = vsel %vm1696_vm2, %v289_v45, %v293_v36  ;;  %1448 = vmatpush3.bf16.msra.mxu0 %v1555_v22  ;;  %v892_v48 = vrot.slane %v890_v34, 5  ;;  %v898_v53 = vshll.u32 %v50_v1, 16  ;;  %v1193_v12 = vcombine.low %v1666_v16, %v1684_v26 }
  0x41   :  { %v1183_v51 = vcombine.low %v280_v43, %v294_v62  ;;  %v897_v44 = vrot.slane %v895_v52, 4  ;;  %v1194_v54 = vcombine.low %v1707_v46, %v1732_v3  ;;  %v1260_v2 = vcombine.low %v1887_v63, %v1908_v28 }
  0x42   :  { %v893_v19 = vsel %vm1696_vm2, %v888_v20, %v892_v48  ;;  %v900_v55 = vrot.slane %v898_v53, 5  ;;  %v904_v16 = vshll.u32 %v51_v56, 16  ;;  %v1195_v26 = vcombine.low %v1747_v10, %v1763_v23 }
  0x43   :  { %1366 = vmatmul.mubr.bf16.gmra.mrb[12].mxu1 %v1183_v51  ;;  %1450 = vmatmul.mubr.bf16.vlgmr.msra.gmra.mrb[0].mxu0 %v1257_v60  ;;  %v1259_v14 = vcombine.low %v1845_v25, %v893_v19  ;;  %v1261_v25 = vcombine.low %v1926_v40, %v1951_v11  ;;  %v1196_v46 = vcombine.low %v1811_v0, %v1825_v6  ;;  %vm1127_vm3 = vcmask 261120  }
  0x44   :  { %1385 = vmatprep.mubr.bf16.mxu1 %v1192_v5  ;;  %1453 = vmatprep.mubr.bf16.mxu0 %v1258_v4  ;;  %v901_v58 = vor.u32 %v900_v55, %v897_v44  ;;  %v1262_v3 = vcombine.low %v266_v38, %v280_v43  ;;  %v906_v28 = vrot.slane %v904_v16, 5  ;;  %v1197_v61 = vcombine.low %v1836_v17, %v1850_v30  ;;  %v2007_v17 = vld [vmem:[%s2055_s2] ss:$0 sm:$0xff]  ;;  %s1588_s2 = smov [#allocation2]  }
  0x45   :  { %v1198_v23 = vcombine.low %v1871_v49, %v1901_v24  ;;  %v1199_v0 = vcombine.low %v1913_v33, %v1932_v47  ;;  %s1149_s13 = sshll.u32 %s1588_s2, 4  ;;  %s1150_s13 = int_to_ptr.vmem [resolvable:$true] %s1149_s13 }
  0x46   :  { %v902_v63 = vrot.slane %v901_v58, 4  ;;  %s1564_s14 = scalar_lea.vmem %s1150_s13, 2048  ;;  %p1569_p1 = scmp.lt.s32.totalorder %s1150_s13, %s1150_s13 }
  0x47   :  { %p1565_p0 = scmp.ne.s32.totalorder %s1150_s13, %s1564_s14  ;;  %p1570_p2 = scmp.lt.s32.totalorder %s1564_s14, %s1564_s14 }
  0x48   :  { %v907_v59 = vsel %vm1696_vm2, %v902_v63, %v906_v28 }
  0x49   :  { %v1263_v10 = vcombine.low %v294_v62, %v907_v59  ;;  %p1571_p3 = por %p1570_p2, %p1569_p1 }
  0x4b   :  { %1386 = vmatmul.mubr.bf16.vlgmr.msra.gmra.mrb[0].mxu1 %v1193_v12  ;;  %1454 = vmatmul.mubr.bf16.gmra.mrb[4].mxu0 %v1259_v14  ;;  %p1572_p4 = pnand %p1571_p3, %p1565_p0 }
  0x4c   :  { %1389 = vmatprep.mubr.bf16.mxu1 %v1194_v54  ;;  %1457 = vmatprep.mubr.bf16.mxu0 %v1260_v2 }
  0x53   :  { %1390 = vmatmul.mubr.bf16.gmra.mrb[4].mxu1 %v1195_v26  ;;  %1458 = vmatmul.mubr.bf16.gmra.mrb[8].mxu0 %v1261_v25 }
  0x54   :  { %1393 = vmatprep.mubr.bf16.mxu1 %v1196_v46  ;;  %1461 = vmatprep.mubr.bf16.mxu0 %v1262_v3 }
  0x5b   :  { %1394 = vmatmul.mubr.bf16.gmra.mrb[8].mxu1 %v1197_v61  ;;  %1462 = vmatmul.mubr.bf16.gmra.mrb[12].mxu0 %v1263_v10 }
  0x5c   :  { %1397 = vmatprep.mubr.bf16.mxu1 %v1198_v23 }
  0x63   :  { %1398 = vmatmul.mubr.bf16.gmra.mrb[12].mxu1 %v1199_v0 }
 0x116   :  { %v1451_v6 = vpop.f32.mrb[0].mxu0 }
 0x117   :  { %v1025_v40 = vpop.f32.mrb[1].mxu0 }
 0x118   :  { %v1452_v7 = vpop.f32.mrb[2].mxu0 }
 0x119   :  { %v1028_v57 = vpop.f32.mrb[3].mxu0 }
 0x11e   :  { %v1387_v41 = vpop.f32.mrb[0].mxu1  ;;  %v1455_v30 = vpop.f32.mrb[4].mxu0 }
 0x11f   :  { %v1465_v8 = vadd.f32 %v1451_v6, %v1387_v41  ;;  %v619_v49 = vpop.f32.mrb[1].mxu1  ;;  %v1041_v24 = vpop.f32.mrb[5].mxu0 }
 0x120   :  { %v1466_v50 = vadd.f32 %v1025_v40, %v619_v49  ;;  %v1388_v9 = vpop.f32.mrb[2].mxu1  ;;  %v1456_v1 = vpop.f32.mrb[6].mxu0 }
 0x121   :  { %v1113_v33 = vadd.f32 %v1465_v8, %v2007_v17  ;;  %v1467_v47 = vadd.f32 %v1452_v7, %v1388_v9  ;;  %v622_v11 = vpop.f32.mrb[3].mxu1  ;;  %v1044_v13 = vpop.f32.mrb[7].mxu0 }
 0x122   :  { %v1111_v15 = vadd.f32 %v1466_v50, %v2007_v17  ;;  %v1468_v21 = vadd.f32 %v1028_v57, %v622_v11 }
 0x123   :  { %1130 = vst.msk [vmem:[#allocation2 + $0x10] sm:$0xff] %vm1127_vm3, %v1113_v33  ;;  %v1114_v22 = vadd.f32 %v1467_v47, %v2007_v17 }
 0x124   :  { %1128 = vst.msk [vmem:[#allocation2] sm:$0xff] %vm1127_vm3, %v1111_v15  ;;  %v1112_v27 = vadd.f32 %v1468_v21, %v2007_v17 }
 0x125   :  { %1131 = vst.msk [vmem:[#allocation2 + $0x18] sm:$0xff] %vm1127_vm3, %v1114_v22 }
 0x126   :  { %1129 = vst.msk [vmem:[#allocation2 + $0x8] sm:$0xff] %vm1127_vm3, %v1112_v27  ;;  %v1391_v29 = vpop.f32.mrb[4].mxu1  ;;  %v1459_v31 = vpop.f32.mrb[8].mxu0 }
 0x127   :  { %v1469_v32 = vadd.f32 %v1455_v30, %v1391_v29  ;;  %v635_v35 = vpop.f32.mrb[5].mxu1  ;;  %v1057_v36 = vpop.f32.mrb[9].mxu0 }
 0x128   :  { %v1470_v38 = vadd.f32 %v1041_v24, %v635_v35  ;;  %v1392_v37 = vpop.f32.mrb[6].mxu1  ;;  %v1460_v39 = vpop.f32.mrb[10].mxu0 }
 0x129   :  { %v1117_v18 = vadd.f32 %v1469_v32, %v2007_v17  ;;  %v1471_v42 = vadd.f32 %v1456_v1, %v1392_v37  ;;  %v638_v43 = vpop.f32.mrb[7].mxu1  ;;  %v1060_v45 = vpop.f32.mrb[11].mxu0 }
 0x12a   :  { %v1115_v34 = vadd.f32 %v1470_v38, %v2007_v17  ;;  %v1472_v60 = vadd.f32 %v1044_v13, %v638_v43 }
 0x12b   :  { %1134 = vst.msk [vmem:[#allocation2 + $0x30] sm:$0xff] %vm1127_vm3, %v1117_v18  ;;  %v1118_v5 = vadd.f32 %v1471_v42, %v2007_v17 }
 0x12c   :  { %1132 = vst.msk [vmem:[#allocation2 + $0x20] sm:$0xff] %vm1127_vm3, %v1115_v34  ;;  %v1116_v62 = vadd.f32 %v1472_v60, %v2007_v17 }
 0x12d   :  { %1135 = vst.msk [vmem:[#allocation2 + $0x38] sm:$0xff] %vm1127_vm3, %v1118_v5 }
 0x12e   :  { %1133 = vst.msk [vmem:[#allocation2 + $0x28] sm:$0xff] %vm1127_vm3, %v1116_v62  ;;  %v1395_v4 = vpop.f32.mrb[8].mxu1  ;;  %v1463_v20 = vpop.f32.mrb[12].mxu0 }
 0x12f   :  { %v1473_v48 = vadd.f32 %v1459_v31, %v1395_v4  ;;  %v651_v51 = vpop.f32.mrb[9].mxu1  ;;  %v1073_v52 = vpop.f32.mrb[13].mxu0 }
 0x130   :  { %v1474_v53 = vadd.f32 %v1057_v36, %v651_v51  ;;  %v1396_v19 = vpop.f32.mrb[10].mxu1  ;;  %v1464_v12 = vpop.f32.mrb[14].mxu0 }
 0x131   :  { %v1121_v14 = vadd.f32 %v1473_v48, %v2007_v17  ;;  %v1475_v44 = vadd.f32 %v1460_v39, %v1396_v19  ;;  %v654_v55 = vpop.f32.mrb[11].mxu1  ;;  %v1076_v54 = vpop.f32.mrb[15].mxu0 }
 0x132   :  { %v1119_v2 = vadd.f32 %v1474_v53, %v2007_v17  ;;  %v1476_v56 = vadd.f32 %v1060_v45, %v654_v55 }
 0x133   :  { %1138 = vst.msk [vmem:[#allocation2 + $0x50] sm:$0xff] %vm1127_vm3, %v1121_v14  ;;  %v1122_v58 = vadd.f32 %v1475_v44, %v2007_v17 }
 0x134   :  { %1136 = vst.msk [vmem:[#allocation2 + $0x40] sm:$0xff] %vm1127_vm3, %v1119_v2  ;;  %v1120_v16 = vadd.f32 %v1476_v56, %v2007_v17 }
 0x135   :  { %1139 = vst.msk [vmem:[#allocation2 + $0x58] sm:$0xff] %vm1127_vm3, %v1122_v58 }
 0x136   :  { %1137 = vst.msk [vmem:[#allocation2 + $0x48] sm:$0xff] %vm1127_vm3, %v1120_v16  ;;  %v1399_v26 = vpop.f32.mrb[12].mxu1 }
 0x137   :  { %v1477_v25 = vadd.f32 %v1463_v20, %v1399_v26  ;;  %v667_v46 = vpop.f32.mrb[13].mxu1 }
 0x138   :  { %v1478_v3 = vadd.f32 %v1073_v52, %v667_v46  ;;  %v1400_v63 = vpop.f32.mrb[14].mxu1 }
 0x139   :  { %v1125_v28 = vadd.f32 %v1477_v25, %v2007_v17  ;;  %v1479_v59 = vadd.f32 %v1464_v12, %v1400_v63  ;;  %v670_v61 = vpop.f32.mrb[15].mxu1 }
 0x13a   :  { %v1123_v10 = vadd.f32 %v1478_v3, %v2007_v17  ;;  %v1480_v23 = vadd.f32 %v1076_v54, %v670_v61 }
 0x13b   :  { %1142 = vst.msk [vmem:[#allocation2 + $0x70] sm:$0xff] %vm1127_vm3, %v1125_v28  ;;  %v1126_v0 = vadd.f32 %v1479_v59, %v2007_v17 }
 0x13c   :  { %1140 = vst.msk [vmem:[#allocation2 + $0x60] sm:$0xff] %vm1127_vm3, %v1123_v10  ;;  %v1124_v6 = vadd.f32 %v1480_v23, %v2007_v17 }
 0x13d   :  { %1143 = vst.msk [vmem:[#allocation2 + $0x78] sm:$0xff] %vm1127_vm3, %v1126_v0 }
 0x13e   :  { %1141 = vst.msk [vmem:[#allocation2 + $0x68] sm:$0xff] %vm1127_vm3, %v1124_v6 }
 0x13f   :  { %1575 = shalt.err (!%p1572_p4)
}
 0x140   :  { %s1576_s17 = scalar_lea.hbm %s2056_s3, 2048 }
 0x141   :  { %p1577_p5 = scmp.ne.s32.totalorder %s2056_s3, %s1576_s17  ;;  %p1580_p6 = scmp.lt.u32.totalorder %s1576_s17, %s2056_s3 }
 0x143   :  { %p1582_p7 = pnand %p1580_p6, %p1577_p5 }
 0x145   :  { %1585 = shalt.err (!%p1582_p7)
}
 0x146   :  { %s1589_s22 = smov 128   ;;  %s1590_s23 = smov 8  }
 0x147   :  { %1155 = dma.vmem_to_hbm [thread:$0]  %s1150_s13, 2048, %s2056_s3, [#allocation3], %s1589_s22, %s1589_s22, %s1590_s23  }
 0x148   :  { %1586 = dma.done.wait [#allocation3], 2048  }
 0x149   :  { %1587 = vsyncadd [#allocation3], 4294965248 }
 0x14a   :  { %1159 = vsyncpa [#allocation3], 1 }

</bundles_post_ra>
